<compile_context>
chip_gen: v6e
topology: v6e:2x2x1
jax: 0.10.0
libtpu: 0.0.40
codegen_flags: <defaults>
</compile_context>

<pallas_src>
import jax
import jax.numpy as jnp
from jax import lax
from jax.experimental import pallas as pl
from jax.experimental.pallas import tpu as pltpu

# ---------------- model hyper-parameters (small, consistent with the module) ---
NUM_TOKENS = 20
NUM_HID    = 32          # H  (4H = 128 = one full lane dim)
NUM_LAYERS = 2           # kernel wavefront is specialized for 2 layers
BATCH      = 2
SEQ        = 8
PARTITION_INIT = 150.0
VOCAB_PAD  = 24          # (NUM_TOKENS + 1) rounded up to a multiple of 8 sublanes
VPAD       = 128         # lane-dense (padded) output-head width

assert NUM_LAYERS == 2, "fused wavefront kernel is specialized for 2 LSTM layers"
assert 4 * NUM_HID == 128

# ---- row layout of the packed parameter slab (all sub-views 8-row aligned) ----
R_EMBWIH0 = 0                      # (VOCAB_PAD, 128)  emb_pad @ Wih0^T
R_WHH0    = R_EMBWIH0 + VOCAB_PAD  # (H, 128)          Whh0^T
R_WIH1    = R_WHH0 + NUM_HID       # (H, 128)          Wih1^T
R_WHH1    = R_WIH1 + NUM_HID       # (H, 128)          Whh1^T
R_WOUT    = R_WHH1 + NUM_HID       # (H, 128)          W_out^T padded to 128 lanes
R_BIAS    = R_WOUT + NUM_HID       # row 0: b0, row 1: b1, row 2: b_out (padded)
SLAB_ROWS = R_BIAS + 8             # 160 rows total (~80 KB f32)


# ------------------------------ fused Pallas kernel ----------------------------
def fused_lstm_kernel(tok_ref, w_ref, logits_ref, hn_ref, cn_ref):
    """Entire forward in one kernel invocation (grid=(1,)).

    tok_ref:    (T*B, 1) int32     time-major token ids (row = t*B + b)
    w_ref:      (SLAB_ROWS, 128)   packed f32 parameter slab (see R_* layout)
    logits_ref: (B, T*128)         batch-major, lane-dense padded logits
    hn_ref:     (L, B, H)          final hidden state per layer
    cn_ref:     (L, B, H)          final cell state per layer
    """
    L, B, H = hn_ref.shape
    TB = tok_ref.shape[0]
    T = TB // B
    G = 4 * H                       # 128

    # --- static 8-aligned sub-views of the packed weight slab (loaded once) ----
    emb_wih0 = w_ref[R_EMBWIH0:R_EMBWIH0 + VOCAB_PAD, :]   # (24, 128)
    whh0     = w_ref[R_WHH0:R_WHH0 + H, :]                 # (32, 128)
    wih1     = w_ref[R_WIH1:R_WIH1 + H, :]                 # (32, 128)
    whh1     = w_ref[R_WHH1:R_WHH1 + H, :]                 # (32, 128)
    wout     = w_ref[R_WOUT:R_WOUT + H, :]                 # (32, 128)
    b0       = w_ref[R_BIAS + 0:R_BIAS + 1, :]             # (1, 128)
    b1       = w_ref[R_BIAS + 1:R_BIAS + 2, :]             # (1, 128)
    bout     = w_ref[R_BIAS + 2:R_BIAS + 3, :]             # (1, 128)

    # --- embedding gather fused with layer-0 input projection: ONE matmul ------
    tok = tok_ref[...]                                                  # (TB, 1)
    onehot = (lax.broadcasted_iota(jnp.int32, (TB, VOCAB_PAD), 1) == tok
              ).astype(jnp.float32)                                     # (TB, 24)
    gates_in0 = jnp.dot(onehot, emb_wih0,
                        preferred_element_type=jnp.float32) + b0        # (TB, 128)

    # --- full-vreg gate activation: one tanh per step covers all four gates ----
    # sigmoid(x) = 0.5 * (tanh(x/2) + 1); tanh lanes are the 'g' gate block.
    lane = lax.broadcasted_iota(jnp.int32, (B, G), 1)
    is_g = (lane >= 2 * H) & (lane < 3 * H)
    pre_scale  = jnp.where(is_g, 1.0, 0.5)
    post_scale = jnp.where(is_g, 1.0, 0.5)
    post_shift = jnp.where(is_g, 0.0, 0.5)

    def activate(g):                       # g: (B, 4H) -> activated [i,f,g,o]
        t = jnp.tanh(g * pre_scale)
        return t * post_scale + post_shift

    zeros = jnp.zeros((B, H), jnp.float32)  # hidden=None in the PyTorch forward
    h0, c0, h1, c1 = zeros, zeros, zeros, zeros

    # --- wavefronted, fully-unrolled recurrence (T=8) ---------------------------
    for t in range(T):
        # layer-1 recurrent matmul depends only on h1_{t-1}: can overlap layer-0.
        g1_rec = jnp.dot(h1, whh1, preferred_element_type=jnp.float32)  # (B, 4H)

        # ---- layer 0, step t ----
        g0 = gates_in0[t * B:(t + 1) * B, :] + jnp.dot(
            h0, whh0, preferred_element_type=jnp.float32)
        a0 = activate(g0)
        c0 = a0[:, H:2 * H] * c0 + a0[:, 0:H] * a0[:, 2 * H:3 * H]
        h0 = a0[:, 3 * H:4 * H] * jnp.tanh(c0)

        # ---- layer 1, step t (input = layer-0 output at step t) ----
        g1 = g1_rec + b1 + jnp.dot(h0, wih1, preferred_element_type=jnp.float32)
        a1 = activate(g1)
        c1 = a1[:, H:2 * H] * c1 + a1[:, 0:H] * a1[:, 2 * H:3 * H]
        h1 = a1[:, 3 * H:4 * H] * jnp.tanh(c1)

        # ---- output head for this timestep: lane-dense, batch-major store ----
        logits_ref[:, t * VPAD:(t + 1) * VPAD] = (
            jnp.dot(h1, wout, preferred_element_type=jnp.float32) + bout)

    hn_ref[0] = h0
    hn_ref[1] = h1
    cn_ref[0] = c0
    cn_ref[1] = c1


# ------------------------------ wrapper ----------------------------------------
def lstm_forward(kparams, x_tokens, mask=None):
    """Equivalent of LSTM.forward(x, mask) with hidden=None, return_all=False.

    x_tokens: (B, T) int32 token ids. `mask` is accepted but unused (as in the
    PyTorch forward). Returns (logits (B, T, num_tokens), (h_n, c_n)).
    """
    B, T = x_tokens.shape
    H = NUM_HID
    L = NUM_LAYERS

    # tiny int transpose to time-major token order (64 bytes; all float tensors
    # stay in VMEM inside the fused kernel and come back batch-major).
    tok_tm = jnp.transpose(x_tokens).reshape(T * B, 1).astype(jnp.int32)

    logits_slab, h_n, c_n = pl.pallas_call(
        fused_lstm_kernel,
        out_shape=(jax.ShapeDtypeStruct((B, T * VPAD), jnp.float32),
                   jax.ShapeDtypeStruct((L, B, H), jnp.float32),
                   jax.ShapeDtypeStruct((L, B, H), jnp.float32)),
        grid_spec=pltpu.PrefetchScalarGridSpec(
            num_scalar_prefetch=0,
            grid=(1,),
            in_specs=[pl.BlockSpec((T * B, 1), lambda i: (0, 0)),
                      pl.BlockSpec((SLAB_ROWS, 128), lambda i: (0, 0))],
            out_specs=[pl.BlockSpec((B, T * VPAD), lambda i: (0, 0)),
                       pl.BlockSpec((L, B, H), lambda i: (0, 0, 0)),
                       pl.BlockSpec((L, B, H), lambda i: (0, 0, 0))]),
        compiler_params=pltpu.CompilerParams(
            dimension_semantics=("arbitrary",)),
    )(tok_tm, kparams["slab"])

    # contiguous reshape + lane slice (no transpose HLO)
    logits = logits_slab.reshape(B, T, VPAD)[:, :, :NUM_TOKENS]
    return logits, (h_n, c_n)


# ------------------------------ params -----------------------------------------
def init_params(key, num_tokens, num_hid, num_layers):
    """Deterministic init mimicking PyTorch default shapes / scales (raw layout)."""
    params = {}
    k_emb, key = jax.random.split(key)
    params["emb"] = jax.random.normal(k_emb, (num_tokens + 1, num_hid),
                                      jnp.float32)            # Embedding weight
    bound = 1.0 / jnp.sqrt(num_hid)
    wih, whh, bih, bhh = [], [], [], []
    for _ in range(num_layers):
        k1, k2, k3, k4, key = jax.random.split(key, 5)
        in_size = num_hid                                      # input==hidden size
        wih.append(jax.random.uniform(k1, (4 * num_hid, in_size), jnp.float32,
                                      -bound, bound))
        whh.append(jax.random.uniform(k2, (4 * num_hid, num_hid), jnp.float32,
                                      -bound, bound))
        bih.append(jax.random.uniform(k3, (4 * num_hid,), jnp.float32, -bound, bound))
        bhh.append(jax.random.uniform(k4, (4 * num_hid,), jnp.float32, -bound, bound))
    params["wih"], params["whh"], params["bih"], params["bhh"] = wih, whh, bih, bhh
    k5, k6, key = jax.random.split(key, 3)
    params["w_out"] = jax.random.uniform(k5, (num_tokens, num_hid), jnp.float32,
                                         -bound, bound)        # Linear weight
    params["b_out"] = jax.random.uniform(k6, (num_tokens,), jnp.float32,
                                         -bound, bound)
    params["Z"] = jnp.ones((64,), jnp.float32) * PARTITION_INIT / 64.0
    return params


def prepare_params(params):
    """Done ONCE: transpose weights, pre-sum biases, fuse embedding with the
    layer-0 input projection, pad the head to 128 lanes, and pack everything
    into a single (SLAB_ROWS, 128) f32 slab so the kernel has ONE weight DMA."""
    H = NUM_HID
    V = NUM_TOKENS

    emb_pad = jnp.zeros((VOCAB_PAD, H), jnp.float32).at[:V + 1].set(params["emb"])
    wih0_t = jnp.transpose(params["wih"][0])                   # (H, 4H)
    whh0_t = jnp.transpose(params["whh"][0])                   # (H, 4H)
    wih1_t = jnp.transpose(params["wih"][1])                   # (H, 4H)
    whh1_t = jnp.transpose(params["whh"][1])                   # (H, 4H)
    b0 = params["bih"][0] + params["bhh"][0]                   # (4H,)
    b1 = params["bih"][1] + params["bhh"][1]                   # (4H,)
    w_out_t = jnp.transpose(params["w_out"])                   # (H, V)

    # algebraic fusion: one-hot(tok) @ (emb_pad @ Wih0^T) == (emb lookup) @ Wih0^T
    emb_wih0 = emb_pad @ wih0_t                                # (VOCAB_PAD, 4H)

    slab = jnp.zeros((SLAB_ROWS, 128), jnp.float32)
    slab = slab.at[R_EMBWIH0:R_EMBWIH0 + VOCAB_PAD, :].set(emb_wih0)
    slab = slab.at[R_WHH0:R_WHH0 + H, :].set(whh0_t)
    slab = slab.at[R_WIH1:R_WIH1 + H, :].set(wih1_t)
    slab = slab.at[R_WHH1:R_WHH1 + H, :].set(whh1_t)
    slab = slab.at[R_WOUT:R_WOUT + H, :V].set(w_out_t)         # lane-padded head
    slab = slab.at[R_BIAS + 0, :].set(b0)
    slab = slab.at[R_BIAS + 1, :].set(b1)
    slab = slab.at[R_BIAS + 2, :V].set(params["b_out"])
    return {"slab": slab}


# ------------------------------ pure-JAX reference -------------------------------
def lstm_forward_ref(params, x_tokens):
    B, T = x_tokens.shape
    H = NUM_HID
    x = jnp.take(params["emb"], x_tokens, axis=0).astype(jnp.float32)  # (B,T,H)
    hs, cs = [], []
    for l in range(NUM_LAYERS):
        wih, whh = params["wih"][l], params["whh"][l]
        b = params["bih"][l] + params["bhh"][l]

        def step(carry, x_t):
            h, c = carry
            g = x_t @ wih.T + h @ whh.T + b
            i = jax.nn.sigmoid(g[:, 0 * H:1 * H])
            f = jax.nn.sigmoid(g[:, 1 * H:2 * H])
            gg = jnp.tanh(g[:, 2 * H:3 * H])
            o = jax.nn.sigmoid(g[:, 3 * H:4 * H])
            c_new = f * c + i * gg
            h_new = o * jnp.tanh(c_new)
            return (h_new, c_new), h_new

        h0 = jnp.zeros((B, H), jnp.float32)
        c0 = jnp.zeros((B, H), jnp.float32)
        (h_f, c_f), out = lax.scan(step, (h0, c0), jnp.transpose(x, (1, 0, 2)))
        x = jnp.transpose(out, (1, 0, 2))
        hs.append(h_f)
        cs.append(c_f)
    logits = x @ params["w_out"].T + params["b_out"]
    return logits, (jnp.stack(hs), jnp.stack(cs))


if __name__ == "__main__":
    key = jax.random.PRNGKey(0)
    k_p, k_x = jax.random.split(key)
    params = init_params(k_p, NUM_TOKENS, NUM_HID, NUM_LAYERS)
    kparams = prepare_params(params)            # one-time weight layout prep

    x_tokens = jax.random.randint(k_x, (BATCH, SEQ), 0, NUM_TOKENS + 1, jnp.int32)
    mask = jnp.ones((BATCH, SEQ), jnp.float32)  # accepted but unused (as in PyTorch)

    logits, (h_n, c_n) = jax.block_until_ready(
        jax.jit(lstm_forward)(kparams, x_tokens, mask))

    ref_logits, (ref_h, ref_c) = lstm_forward_ref(params, x_tokens)
    assert logits.shape == (BATCH, SEQ, NUM_TOKENS)
    assert h_n.shape == (NUM_LAYERS, BATCH, NUM_HID)
    assert c_n.shape == (NUM_LAYERS, BATCH, NUM_HID)
    assert jnp.max(jnp.abs(logits - ref_logits)) < 1e-4
    assert jnp.max(jnp.abs(h_n - ref_h)) < 1e-4
    assert jnp.max(jnp.abs(c_n - ref_c)) < 1e-4

    print("KERNEL_OK")
</pallas_src>

<mosaic_0001>
module attributes {stable_mosaic.version = 11 : i64} {
  func.func @fused_lstm_kernel(%arg0: i32, %arg1: memref<16x1xi32, #tpu.memory_space<vmem>>, %arg2: memref<160x128xf32, #tpu.memory_space<vmem>>, %arg3: memref<2x1024xf32, #tpu.memory_space<vmem>>, %arg4: memref<2x2x32xf32, #tpu.memory_space<vmem>>, %arg5: memref<2x2x32xf32, #tpu.memory_space<vmem>>) attributes {dimension_semantics = [#tpu.dimension_semantics<arbitrary>], iteration_bounds = array<i64: 1>, scalar_prefetch = 0 : i64, scratch_operands = 0 : i64, tpu.core_type = #tpu.core_type<tc>, window_params = [{pipeline_mode = #tpu.pipeline_mode<synchronous>, transform_indices = @transform_0, window_bounds = array<i64: 16, 1>}, {pipeline_mode = #tpu.pipeline_mode<synchronous>, transform_indices = @transform_1, window_bounds = array<i64: 160, 128>}, {pipeline_mode = #tpu.pipeline_mode<synchronous>, transform_indices = @transform_2, window_bounds = array<i64: 2, 1024>}, {pipeline_mode = #tpu.pipeline_mode<synchronous>, transform_indices = @transform_3, window_bounds = array<i64: 2, 2, 32>}, {pipeline_mode = #tpu.pipeline_mode<synchronous>, transform_indices = @transform_4, window_bounds = array<i64: 2, 2, 32>}]} {
    %c0 = arith.constant 0 : index
    %c0_0 = arith.constant 0 : index
    %0 = vector.load %arg2[%c0, %c0_0] : memref<160x128xf32, #tpu.memory_space<vmem>>, vector<24x128xf32>
    %c24 = arith.constant 24 : index
    %c0_1 = arith.constant 0 : index
    %1 = vector.load %arg2[%c24, %c0_1] : memref<160x128xf32, #tpu.memory_space<vmem>>, vector<32x128xf32>
    %c56 = arith.constant 56 : index
    %c0_2 = arith.constant 0 : index
    %2 = vector.load %arg2[%c56, %c0_2] : memref<160x128xf32, #tpu.memory_space<vmem>>, vector<32x128xf32>
    %c88 = arith.constant 88 : index
    %c0_3 = arith.constant 0 : index
    %3 = vector.load %arg2[%c88, %c0_3] : memref<160x128xf32, #tpu.memory_space<vmem>>, vector<32x128xf32>
    %c120 = arith.constant 120 : index
    %c0_4 = arith.constant 0 : index
    %4 = vector.load %arg2[%c120, %c0_4] : memref<160x128xf32, #tpu.memory_space<vmem>>, vector<32x128xf32>
    %c152 = arith.constant 152 : index
    %c0_5 = arith.constant 0 : index
    %5 = vector.load %arg2[%c152, %c0_5] : memref<160x128xf32, #tpu.memory_space<vmem>>, vector<1x128xf32>
    %c153 = arith.constant 153 : index
    %c0_6 = arith.constant 0 : index
    %6 = vector.load %arg2[%c153, %c0_6] : memref<160x128xf32, #tpu.memory_space<vmem>>, vector<1x128xf32>
    %c154 = arith.constant 154 : index
    %c0_7 = arith.constant 0 : index
    %7 = vector.load %arg2[%c154, %c0_7] : memref<160x128xf32, #tpu.memory_space<vmem>>, vector<1x128xf32>
    %c0_8 = arith.constant 0 : index
    %c0_9 = arith.constant 0 : index
    %8 = vector.load %arg1[%c0_8, %c0_9] : memref<16x1xi32, #tpu.memory_space<vmem>>, vector<16x1xi32>
    %9 = tpu.iota {dimensions = array<i32: 1>} : vector<16x24xi32>
    %10 = vector.broadcast %8 : vector<16x1xi32> to vector<16x24xi32>
    %11 = arith.cmpi eq, %9, %10 : vector<16x24xi32>
    %12 = arith.extui %11 : vector<16x24xi1> to vector<16x24xi32>
    %13 = arith.sitofp %12 : vector<16x24xi32> to vector<16x24xf32>
    %cst = arith.constant dense<0.000000e+00> : vector<16x128xf32>
    %14 = tpu.matmul %13, %0, %cst {dimension_numbers = #tpu.dot_dimension_numbers<[1], [0], [0], [1], [0, 0, 1, 1], [], []>} : vector<16x24xf32>, vector<24x128xf32>, vector<16x128xf32> -> vector<16x128xf32>
    %15 = vector.broadcast %5 : vector<1x128xf32> to vector<16x128xf32>
    %16 = arith.addf %14, %15 : vector<16x128xf32>
    %17 = tpu.iota {dimensions = array<i32: 1>} : vector<2x128xi32>
    %c64_i32 = arith.constant 64 : i32
    %18 = vector.broadcast %c64_i32 : i32 to vector<2x128xi32>
    %19 = arith.cmpi sge, %17, %18 : vector<2x128xi32>
    %c96_i32 = arith.constant 96 : i32
    %20 = vector.broadcast %c96_i32 : i32 to vector<2x128xi32>
    %21 = arith.cmpi slt, %17, %20 : vector<2x128xi32>
    %22 = arith.andi %19, %21 : vector<2x128xi1>
    %cst_10 = arith.constant 1.000000e+00 : f32
    %cst_11 = arith.constant 5.000000e-01 : f32
    %23 = vector.broadcast %cst_10 : f32 to vector<2x128xf32>
    %24 = vector.broadcast %cst_11 : f32 to vector<2x128xf32>
    %25 = arith.select %22, %23, %24 : vector<2x128xi1>, vector<2x128xf32>
    %cst_12 = arith.constant 1.000000e+00 : f32
    %cst_13 = arith.constant 5.000000e-01 : f32
    %26 = vector.broadcast %cst_12 : f32 to vector<2x128xf32>
    %27 = vector.broadcast %cst_13 : f32 to vector<2x128xf32>
    %28 = arith.select %22, %26, %27 : vector<2x128xi1>, vector<2x128xf32>
    %cst_14 = arith.constant 0.000000e+00 : f32
    %cst_15 = arith.constant 5.000000e-01 : f32
    %29 = vector.broadcast %cst_14 : f32 to vector<2x128xf32>
    %30 = vector.broadcast %cst_15 : f32 to vector<2x128xf32>
    %31 = arith.select %22, %29, %30 : vector<2x128xi1>, vector<2x128xf32>
    %cst_16 = arith.constant 0.000000e+00 : f32
    %32 = vector.broadcast %cst_16 : f32 to vector<2x32xf32>
    %cst_17 = arith.constant dense<0.000000e+00> : vector<2x128xf32>
    %33 = tpu.matmul %32, %3, %cst_17 {dimension_numbers = #tpu.dot_dimension_numbers<[1], [0], [0], [1], [0, 0, 1, 1], [], []>} : vector<2x32xf32>, vector<32x128xf32>, vector<2x128xf32> -> vector<2x128xf32>
    %34 = vector.extract_strided_slice %16 {offsets = [0, 0], sizes = [2, 128], strides = [1, 1]} : vector<16x128xf32> to vector<2x128xf32>
    %cst_18 = arith.constant dense<0.000000e+00> : vector<2x128xf32>
    %35 = tpu.matmul %32, %1, %cst_18 {dimension_numbers = #tpu.dot_dimension_numbers<[1], [0], [0], [1], [0, 0, 1, 1], [], []>} : vector<2x32xf32>, vector<32x128xf32>, vector<2x128xf32> -> vector<2x128xf32>
    %36 = arith.addf %34, %35 : vector<2x128xf32>
    %37 = arith.mulf %36, %25 : vector<2x128xf32>
    %38 = math.tanh %37 : vector<2x128xf32>
    %39 = arith.mulf %38, %28 : vector<2x128xf32>
    %40 = arith.addf %39, %31 : vector<2x128xf32>
    %41 = vector.extract_strided_slice %40 {offsets = [0, 32], sizes = [2, 32], strides = [1, 1]} : vector<2x128xf32> to vector<2x32xf32>
    %42 = arith.mulf %41, %32 : vector<2x32xf32>
    %43 = vector.extract_strided_slice %40 {offsets = [0, 0], sizes = [2, 32], strides = [1, 1]} : vector<2x128xf32> to vector<2x32xf32>
    %44 = vector.extract_strided_slice %40 {offsets = [0, 64], sizes = [2, 32], strides = [1, 1]} : vector<2x128xf32> to vector<2x32xf32>
    %45 = arith.mulf %43, %44 : vector<2x32xf32>
    %46 = arith.addf %42, %45 : vector<2x32xf32>
    %47 = vector.extract_strided_slice %40 {offsets = [0, 96], sizes = [2, 32], strides = [1, 1]} : vector<2x128xf32> to vector<2x32xf32>
    %48 = math.tanh %46 : vector<2x32xf32>
    %49 = arith.mulf %47, %48 : vector<2x32xf32>
    %50 = vector.broadcast %6 : vector<1x128xf32> to vector<2x128xf32>
    %51 = arith.addf %33, %50 : vector<2x128xf32>
    %cst_19 = arith.constant dense<0.000000e+00> : vector<2x128xf32>
    %52 = tpu.matmul %49, %2, %cst_19 {dimension_numbers = #tpu.dot_dimension_numbers<[1], [0], [0], [1], [0, 0, 1, 1], [], []>} : vector<2x32xf32>, vector<32x128xf32>, vector<2x128xf32> -> vector<2x128xf32>
    %53 = arith.addf %51, %52 : vector<2x128xf32>
    %54 = arith.mulf %53, %25 : vector<2x128xf32>
    %55 = math.tanh %54 : vector<2x128xf32>
    %56 = arith.mulf %55, %28 : vector<2x128xf32>
    %57 = arith.addf %56, %31 : vector<2x128xf32>
    %58 = vector.extract_strided_slice %57 {offsets = [0, 32], sizes = [2, 32], strides = [1, 1]} : vector<2x128xf32> to vector<2x32xf32>
    %59 = arith.mulf %58, %32 : vector<2x32xf32>
    %60 = vector.extract_strided_slice %57 {offsets = [0, 0], sizes = [2, 32], strides = [1, 1]} : vector<2x128xf32> to vector<2x32xf32>
    %61 = vector.extract_strided_slice %57 {offsets = [0, 64], sizes = [2, 32], strides = [1, 1]} : vector<2x128xf32> to vector<2x32xf32>
    %62 = arith.mulf %60, %61 : vector<2x32xf32>
    %63 = arith.addf %59, %62 : vector<2x32xf32>
    %64 = vector.extract_strided_slice %57 {offsets = [0, 96], sizes = [2, 32], strides = [1, 1]} : vector<2x128xf32> to vector<2x32xf32>
    %65 = math.tanh %63 : vector<2x32xf32>
    %66 = arith.mulf %64, %65 : vector<2x32xf32>
    %cst_20 = arith.constant dense<0.000000e+00> : vector<2x128xf32>
    %67 = tpu.matmul %66, %4, %cst_20 {dimension_numbers = #tpu.dot_dimension_numbers<[1], [0], [0], [1], [0, 0, 1, 1], [], []>} : vector<2x32xf32>, vector<32x128xf32>, vector<2x128xf32> -> vector<2x128xf32>
    %68 = vector.broadcast %7 : vector<1x128xf32> to vector<2x128xf32>
    %69 = arith.addf %67, %68 : vector<2x128xf32>
    %c0_21 = arith.constant 0 : index
    %c0_22 = arith.constant 0 : index
    %70 = vector.load %arg3[%c0_21, %c0_22] : memref<2x1024xf32, #tpu.memory_space<vmem>>, vector<2x128xf32>
    tpu.vector_store %arg3[%c0_21, %c0_22], %69 {strides = array<i32>} : memref<2x1024xf32, #tpu.memory_space<vmem>>, vector<2x128xf32>,
    %cst_23 = arith.constant dense<0.000000e+00> : vector<2x128xf32>
    %71 = tpu.matmul %66, %3, %cst_23 {dimension_numbers = #tpu.dot_dimension_numbers<[1], [0], [0], [1], [0, 0, 1, 1], [], []>} : vector<2x32xf32>, vector<32x128xf32>, vector<2x128xf32> -> vector<2x128xf32>
    %72 = vector.extract_strided_slice %16 {offsets = [2, 0], sizes = [2, 128], strides = [1, 1]} : vector<16x128xf32> to vector<2x128xf32>
    %cst_24 = arith.constant dense<0.000000e+00> : vector<2x128xf32>
    %73 = tpu.matmul %49, %1, %cst_24 {dimension_numbers = #tpu.dot_dimension_numbers<[1], [0], [0], [1], [0, 0, 1, 1], [], []>} : vector<2x32xf32>, vector<32x128xf32>, vector<2x128xf32> -> vector<2x128xf32>
    %74 = arith.addf %72, %73 : vector<2x128xf32>
    %75 = arith.mulf %74, %25 : vector<2x128xf32>
    %76 = math.tanh %75 : vector<2x128xf32>
    %77 = arith.mulf %76, %28 : vector<2x128xf32>
    %78 = arith.addf %77, %31 : vector<2x128xf32>
    %79 = vector.extract_strided_slice %78 {offsets = [0, 32], sizes = [2, 32], strides = [1, 1]} : vector<2x128xf32> to vector<2x32xf32>
    %80 = arith.mulf %79, %46 : vector<2x32xf32>
    %81 = vector.extract_strided_slice %78 {offsets = [0, 0], sizes = [2, 32], strides = [1, 1]} : vector<2x128xf32> to vector<2x32xf32>
    %82 = vector.extract_strided_slice %78 {offsets = [0, 64], sizes = [2, 32], strides = [1, 1]} : vector<2x128xf32> to vector<2x32xf32>
    %83 = arith.mulf %81, %82 : vector<2x32xf32>
    %84 = arith.addf %80, %83 : vector<2x32xf32>
    %85 = vector.extract_strided_slice %78 {offsets = [0, 96], sizes = [2, 32], strides = [1, 1]} : vector<2x128xf32> to vector<2x32xf32>
    %86 = math.tanh %84 : vector<2x32xf32>
    %87 = arith.mulf %85, %86 : vector<2x32xf32>
    %88 = vector.broadcast %6 : vector<1x128xf32> to vector<2x128xf32>
    %89 = arith.addf %71, %88 : vector<2x128xf32>
    %cst_25 = arith.constant dense<0.000000e+00> : vector<2x128xf32>
    %90 = tpu.matmul %87, %2, %cst_25 {dimension_numbers = #tpu.dot_dimension_numbers<[1], [0], [0], [1], [0, 0, 1, 1], [], []>} : vector<2x32xf32>, vector<32x128xf32>, vector<2x128xf32> -> vector<2x128xf32>
    %91 = arith.addf %89, %90 : vector<2x128xf32>
    %92 = arith.mulf %91, %25 : vector<2x128xf32>
    %93 = math.tanh %92 : vector<2x128xf32>
    %94 = arith.mulf %93, %28 : vector<2x128xf32>
    %95 = arith.addf %94, %31 : vector<2x128xf32>
    %96 = vector.extract_strided_slice %95 {offsets = [0, 32], sizes = [2, 32], strides = [1, 1]} : vector<2x128xf32> to vector<2x32xf32>
    %97 = arith.mulf %96, %63 : vector<2x32xf32>
    %98 = vector.extract_strided_slice %95 {offsets = [0, 0], sizes = [2, 32], strides = [1, 1]} : vector<2x128xf32> to vector<2x32xf32>
    %99 = vector.extract_strided_slice %95 {offsets = [0, 64], sizes = [2, 32], strides = [1, 1]} : vector<2x128xf32> to vector<2x32xf32>
    %100 = arith.mulf %98, %99 : vector<2x32xf32>
    %101 = arith.addf %97, %100 : vector<2x32xf32>
    %102 = vector.extract_strided_slice %95 {offsets = [0, 96], sizes = [2, 32], strides = [1, 1]} : vector<2x128xf32> to vector<2x32xf32>
    %103 = math.tanh %101 : vector<2x32xf32>
    %104 = arith.mulf %102, %103 : vector<2x32xf32>
    %cst_26 = arith.constant dense<0.000000e+00> : vector<2x128xf32>
    %105 = tpu.matmul %104, %4, %cst_26 {dimension_numbers = #tpu.dot_dimension_numbers<[1], [0], [0], [1], [0, 0, 1, 1], [], []>} : vector<2x32xf32>, vector<32x128xf32>, vector<2x128xf32> -> vector<2x128xf32>
    %106 = vector.broadcast %7 : vector<1x128xf32> to vector<2x128xf32>
    %107 = arith.addf %105, %106 : vector<2x128xf32>
    %c0_27 = arith.constant 0 : index
    %c128 = arith.constant 128 : index
    %108 = vector.load %arg3[%c0_27, %c128] : memref<2x1024xf32, #tpu.memory_space<vmem>>, vector<2x128xf32>
    tpu.vector_store %arg3[%c0_27, %c128], %107 {strides = array<i32>} : memref<2x1024xf32, #tpu.memory_space<vmem>>, vector<2x128xf32>,
    %cst_28 = arith.constant dense<0.000000e+00> : vector<2x128xf32>
    %109 = tpu.matmul %104, %3, %cst_28 {dimension_numbers = #tpu.dot_dimension_numbers<[1], [0], [0], [1], [0, 0, 1, 1], [], []>} : vector<2x32xf32>, vector<32x128xf32>, vector<2x128xf32> -> vector<2x128xf32>
    %110 = vector.extract_strided_slice %16 {offsets = [4, 0], sizes = [2, 128], strides = [1, 1]} : vector<16x128xf32> to vector<2x128xf32>
    %cst_29 = arith.constant dense<0.000000e+00> : vector<2x128xf32>
    %111 = tpu.matmul %87, %1, %cst_29 {dimension_numbers = #tpu.dot_dimension_numbers<[1], [0], [0], [1], [0, 0, 1, 1], [], []>} : vector<2x32xf32>, vector<32x128xf32>, vector<2x128xf32> -> vector<2x128xf32>
    %112 = arith.addf %110, %111 : vector<2x128xf32>
    %113 = arith.mulf %112, %25 : vector<2x128xf32>
    %114 = math.tanh %113 : vector<2x128xf32>
    %115 = arith.mulf %114, %28 : vector<2x128xf32>
    %116 = arith.addf %115, %31 : vector<2x128xf32>
    %117 = vector.extract_strided_slice %116 {offsets = [0, 32], sizes = [2, 32], strides = [1, 1]} : vector<2x128xf32> to vector<2x32xf32>
    %118 = arith.mulf %117, %84 : vector<2x32xf32>
    %119 = vector.extract_strided_slice %116 {offsets = [0, 0], sizes = [2, 32], strides = [1, 1]} : vector<2x128xf32> to vector<2x32xf32>
    %120 = vector.extract_strided_slice %116 {offsets = [0, 64], sizes = [2, 32], strides = [1, 1]} : vector<2x128xf32> to vector<2x32xf32>
    %121 = arith.mulf %119, %120 : vector<2x32xf32>
    %122 = arith.addf %118, %121 : vector<2x32xf32>
    %123 = vector.extract_strided_slice %116 {offsets = [0, 96], sizes = [2, 32], strides = [1, 1]} : vector<2x128xf32> to vector<2x32xf32>
    %124 = math.tanh %122 : vector<2x32xf32>
    %125 = arith.mulf %123, %124 : vector<2x32xf32>
    %126 = vector.broadcast %6 : vector<1x128xf32> to vector<2x128xf32>
    %127 = arith.addf %109, %126 : vector<2x128xf32>
    %cst_30 = arith.constant dense<0.000000e+00> : vector<2x128xf32>
    %128 = tpu.matmul %125, %2, %cst_30 {dimension_numbers = #tpu.dot_dimension_numbers<[1], [0], [0], [1], [0, 0, 1, 1], [], []>} : vector<2x32xf32>, vector<32x128xf32>, vector<2x128xf32> -> vector<2x128xf32>
    %129 = arith.addf %127, %128 : vector<2x128xf32>
    %130 = arith.mulf %129, %25 : vector<2x128xf32>
    %131 = math.tanh %130 : vector<2x128xf32>
    %132 = arith.mulf %131, %28 : vector<2x128xf32>
    %133 = arith.addf %132, %31 : vector<2x128xf32>
    %134 = vector.extract_strided_slice %133 {offsets = [0, 32], sizes = [2, 32], strides = [1, 1]} : vector<2x128xf32> to vector<2x32xf32>
    %135 = arith.mulf %134, %101 : vector<2x32xf32>
    %136 = vector.extract_strided_slice %133 {offsets = [0, 0], sizes = [2, 32], strides = [1, 1]} : vector<2x128xf32> to vector<2x32xf32>
    %137 = vector.extract_strided_slice %133 {offsets = [0, 64], sizes = [2, 32], strides = [1, 1]} : vector<2x128xf32> to vector<2x32xf32>
    %138 = arith.mulf %136, %137 : vector<2x32xf32>
    %139 = arith.addf %135, %138 : vector<2x32xf32>
    %140 = vector.extract_strided_slice %133 {offsets = [0, 96], sizes = [2, 32], strides = [1, 1]} : vector<2x128xf32> to vector<2x32xf32>
    %141 = math.tanh %139 : vector<2x32xf32>
    %142 = arith.mulf %140, %141 : vector<2x32xf32>
    %cst_31 = arith.constant dense<0.000000e+00> : vector<2x128xf32>
    %143 = tpu.matmul %142, %4, %cst_31 {dimension_numbers = #tpu.dot_dimension_numbers<[1], [0], [0], [1], [0, 0, 1, 1], [], []>} : vector<2x32xf32>, vector<32x128xf32>, vector<2x128xf32> -> vector<2x128xf32>
    %144 = vector.broadcast %7 : vector<1x128xf32> to vector<2x128xf32>
    %145 = arith.addf %143, %144 : vector<2x128xf32>
    %c0_32 = arith.constant 0 : index
    %c256 = arith.constant 256 : index
    %146 = vector.load %arg3[%c0_32, %c256] : memref<2x1024xf32, #tpu.memory_space<vmem>>, vector<2x128xf32>
    tpu.vector_store %arg3[%c0_32, %c256], %145 {strides = array<i32>} : memref<2x1024xf32, #tpu.memory_space<vmem>>, vector<2x128xf32>,
    %cst_33 = arith.constant dense<0.000000e+00> : vector<2x128xf32>
    %147 = tpu.matmul %142, %3, %cst_33 {dimension_numbers = #tpu.dot_dimension_numbers<[1], [0], [0], [1], [0, 0, 1, 1], [], []>} : vector<2x32xf32>, vector<32x128xf32>, vector<2x128xf32> -> vector<2x128xf32>
    %148 = vector.extract_strided_slice %16 {offsets = [6, 0], sizes = [2, 128], strides = [1, 1]} : vector<16x128xf32> to vector<2x128xf32>
    %cst_34 = arith.constant dense<0.000000e+00> : vector<2x128xf32>
    %149 = tpu.matmul %125, %1, %cst_34 {dimension_numbers = #tpu.dot_dimension_numbers<[1], [0], [0], [1], [0, 0, 1, 1], [], []>} : vector<2x32xf32>, vector<32x128xf32>, vector<2x128xf32> -> vector<2x128xf32>
    %150 = arith.addf %148, %149 : vector<2x128xf32>
    %151 = arith.mulf %150, %25 : vector<2x128xf32>
    %152 = math.tanh %151 : vector<2x128xf32>
    %153 = arith.mulf %152, %28 : vector<2x128xf32>
    %154 = arith.addf %153, %31 : vector<2x128xf32>
    %155 = vector.extract_strided_slice %154 {offsets = [0, 32], sizes = [2, 32], strides = [1, 1]} : vector<2x128xf32> to vector<2x32xf32>
    %156 = arith.mulf %155, %122 : vector<2x32xf32>
    %157 = vector.extract_strided_slice %154 {offsets = [0, 0], sizes = [2, 32], strides = [1, 1]} : vector<2x128xf32> to vector<2x32xf32>
    %158 = vector.extract_strided_slice %154 {offsets = [0, 64], sizes = [2, 32], strides = [1, 1]} : vector<2x128xf32> to vector<2x32xf32>
    %159 = arith.mulf %157, %158 : vector<2x32xf32>
    %160 = arith.addf %156, %159 : vector<2x32xf32>
    %161 = vector.extract_strided_slice %154 {offsets = [0, 96], sizes = [2, 32], strides = [1, 1]} : vector<2x128xf32> to vector<2x32xf32>
    %162 = math.tanh %160 : vector<2x32xf32>
    %163 = arith.mulf %161, %162 : vector<2x32xf32>
    %164 = vector.broadcast %6 : vector<1x128xf32> to vector<2x128xf32>
    %165 = arith.addf %147, %164 : vector<2x128xf32>
    %cst_35 = arith.constant dense<0.000000e+00> : vector<2x128xf32>
    %166 = tpu.matmul %163, %2, %cst_35 {dimension_numbers = #tpu.dot_dimension_numbers<[1], [0], [0], [1], [0, 0, 1, 1], [], []>} : vector<2x32xf32>, vector<32x128xf32>, vector<2x128xf32> -> vector<2x128xf32>
    %167 = arith.addf %165, %166 : vector<2x128xf32>
    %168 = arith.mulf %167, %25 : vector<2x128xf32>
    %169 = math.tanh %168 : vector<2x128xf32>
    %170 = arith.mulf %169, %28 : vector<2x128xf32>
    %171 = arith.addf %170, %31 : vector<2x128xf32>
    %172 = vector.extract_strided_slice %171 {offsets = [0, 32], sizes = [2, 32], strides = [1, 1]} : vector<2x128xf32> to vector<2x32xf32>
    %173 = arith.mulf %172, %139 : vector<2x32xf32>
    %174 = vector.extract_strided_slice %171 {offsets = [0, 0], sizes = [2, 32], strides = [1, 1]} : vector<2x128xf32> to vector<2x32xf32>
    %175 = vector.extract_strided_slice %171 {offsets = [0, 64], sizes = [2, 32], strides = [1, 1]} : vector<2x128xf32> to vector<2x32xf32>
    %176 = arith.mulf %174, %175 : vector<2x32xf32>
    %177 = arith.addf %173, %176 : vector<2x32xf32>
    %178 = vector.extract_strided_slice %171 {offsets = [0, 96], sizes = [2, 32], strides = [1, 1]} : vector<2x128xf32> to vector<2x32xf32>
    %179 = math.tanh %177 : vector<2x32xf32>
    %180 = arith.mulf %178, %179 : vector<2x32xf32>
    %cst_36 = arith.constant dense<0.000000e+00> : vector<2x128xf32>
    %181 = tpu.matmul %180, %4, %cst_36 {dimension_numbers = #tpu.dot_dimension_numbers<[1], [0], [0], [1], [0, 0, 1, 1], [], []>} : vector<2x32xf32>, vector<32x128xf32>, vector<2x128xf32> -> vector<2x128xf32>
    %182 = vector.broadcast %7 : vector<1x128xf32> to vector<2x128xf32>
    %183 = arith.addf %181, %182 : vector<2x128xf32>
    %c0_37 = arith.constant 0 : index
    %c384 = arith.constant 384 : index
    %184 = vector.load %arg3[%c0_37, %c384] : memref<2x1024xf32, #tpu.memory_space<vmem>>, vector<2x128xf32>
    tpu.vector_store %arg3[%c0_37, %c384], %183 {strides = array<i32>} : memref<2x1024xf32, #tpu.memory_space<vmem>>, vector<2x128xf32>,
    %cst_38 = arith.constant dense<0.000000e+00> : vector<2x128xf32>
    %185 = tpu.matmul %180, %3, %cst_38 {dimension_numbers = #tpu.dot_dimension_numbers<[1], [0], [0], [1], [0, 0, 1, 1], [], []>} : vector<2x32xf32>, vector<32x128xf32>, vector<2x128xf32> -> vector<2x128xf32>
    %186 = vector.extract_strided_slice %16 {offsets = [8, 0], sizes = [2, 128], strides = [1, 1]} : vector<16x128xf32> to vector<2x128xf32>
    %cst_39 = arith.constant dense<0.000000e+00> : vector<2x128xf32>
    %187 = tpu.matmul %163, %1, %cst_39 {dimension_numbers = #tpu.dot_dimension_numbers<[1], [0], [0], [1], [0, 0, 1, 1], [], []>} : vector<2x32xf32>, vector<32x128xf32>, vector<2x128xf32> -> vector<2x128xf32>
    %188 = arith.addf %186, %187 : vector<2x128xf32>
    %189 = arith.mulf %188, %25 : vector<2x128xf32>
    %190 = math.tanh %189 : vector<2x128xf32>
    %191 = arith.mulf %190, %28 : vector<2x128xf32>
    %192 = arith.addf %191, %31 : vector<2x128xf32>
    %193 = vector.extract_strided_slice %192 {offsets = [0, 32], sizes = [2, 32], strides = [1, 1]} : vector<2x128xf32> to vector<2x32xf32>
    %194 = arith.mulf %193, %160 : vector<2x32xf32>
    %195 = vector.extract_strided_slice %192 {offsets = [0, 0], sizes = [2, 32], strides = [1, 1]} : vector<2x128xf32> to vector<2x32xf32>
    %196 = vector.extract_strided_slice %192 {offsets = [0, 64], sizes = [2, 32], strides = [1, 1]} : vector<2x128xf32> to vector<2x32xf32>
    %197 = arith.mulf %195, %196 : vector<2x32xf32>
    %198 = arith.addf %194, %197 : vector<2x32xf32>
    %199 = vector.extract_strided_slice %192 {offsets = [0, 96], sizes = [2, 32], strides = [1, 1]} : vector<2x128xf32> to vector<2x32xf32>
    %200 = math.tanh %198 : vector<2x32xf32>
    %201 = arith.mulf %199, %200 : vector<2x32xf32>
    %202 = vector.broadcast %6 : vector<1x128xf32> to vector<2x128xf32>
    %203 = arith.addf %185, %202 : vector<2x128xf32>
    %cst_40 = arith.constant dense<0.000000e+00> : vector<2x128xf32>
    %204 = tpu.matmul %201, %2, %cst_40 {dimension_numbers = #tpu.dot_dimension_numbers<[1], [0], [0], [1], [0, 0, 1, 1], [], []>} : vector<2x32xf32>, vector<32x128xf32>, vector<2x128xf32> -> vector<2x128xf32>
    %205 = arith.addf %203, %204 : vector<2x128xf32>
    %206 = arith.mulf %205, %25 : vector<2x128xf32>
    %207 = math.tanh %206 : vector<2x128xf32>
    %208 = arith.mulf %207, %28 : vector<2x128xf32>
    %209 = arith.addf %208, %31 : vector<2x128xf32>
    %210 = vector.extract_strided_slice %209 {offsets = [0, 32], sizes = [2, 32], strides = [1, 1]} : vector<2x128xf32> to vector<2x32xf32>
    %211 = arith.mulf %210, %177 : vector<2x32xf32>
    %212 = vector.extract_strided_slice %209 {offsets = [0, 0], sizes = [2, 32], strides = [1, 1]} : vector<2x128xf32> to vector<2x32xf32>
    %213 = vector.extract_strided_slice %209 {offsets = [0, 64], sizes = [2, 32], strides = [1, 1]} : vector<2x128xf32> to vector<2x32xf32>
    %214 = arith.mulf %212, %213 : vector<2x32xf32>
    %215 = arith.addf %211, %214 : vector<2x32xf32>
    %216 = vector.extract_strided_slice %209 {offsets = [0, 96], sizes = [2, 32], strides = [1, 1]} : vector<2x128xf32> to vector<2x32xf32>
    %217 = math.tanh %215 : vector<2x32xf32>
    %218 = arith.mulf %216, %217 : vector<2x32xf32>
    %cst_41 = arith.constant dense<0.000000e+00> : vector<2x128xf32>
    %219 = tpu.matmul %218, %4, %cst_41 {dimension_numbers = #tpu.dot_dimension_numbers<[1], [0], [0], [1], [0, 0, 1, 1], [], []>} : vector<2x32xf32>, vector<32x128xf32>, vector<2x128xf32> -> vector<2x128xf32>
    %220 = vector.broadcast %7 : vector<1x128xf32> to vector<2x128xf32>
    %221 = arith.addf %219, %220 : vector<2x128xf32>
    %c0_42 = arith.constant 0 : index
    %c512 = arith.constant 512 : index
    %222 = vector.load %arg3[%c0_42, %c512] : memref<2x1024xf32, #tpu.memory_space<vmem>>, vector<2x128xf32>
    tpu.vector_store %arg3[%c0_42, %c512], %221 {strides = array<i32>} : memref<2x1024xf32, #tpu.memory_space<vmem>>, vector<2x128xf32>,
    %cst_43 = arith.constant dense<0.000000e+00> : vector<2x128xf32>
    %223 = tpu.matmul %218, %3, %cst_43 {dimension_numbers = #tpu.dot_dimension_numbers<[1], [0], [0], [1], [0, 0, 1, 1], [], []>} : vector<2x32xf32>, vector<32x128xf32>, vector<2x128xf32> -> vector<2x128xf32>
    %224 = vector.extract_strided_slice %16 {offsets = [10, 0], sizes = [2, 128], strides = [1, 1]} : vector<16x128xf32> to vector<2x128xf32>
    %cst_44 = arith.constant dense<0.000000e+00> : vector<2x128xf32>
    %225 = tpu.matmul %201, %1, %cst_44 {dimension_numbers = #tpu.dot_dimension_numbers<[1], [0], [0], [1], [0, 0, 1, 1], [], []>} : vector<2x32xf32>, vector<32x128xf32>, vector<2x128xf32> -> vector<2x128xf32>
    %226 = arith.addf %224, %225 : vector<2x128xf32>
    %227 = arith.mulf %226, %25 : vector<2x128xf32>
    %228 = math.tanh %227 : vector<2x128xf32>
    %229 = arith.mulf %228, %28 : vector<2x128xf32>
    %230 = arith.addf %229, %31 : vector<2x128xf32>
    %231 = vector.extract_strided_slice %230 {offsets = [0, 32], sizes = [2, 32], strides = [1, 1]} : vector<2x128xf32> to vector<2x32xf32>
    %232 = arith.mulf %231, %198 : vector<2x32xf32>
    %233 = vector.extract_strided_slice %230 {offsets = [0, 0], sizes = [2, 32], strides = [1, 1]} : vector<2x128xf32> to vector<2x32xf32>
    %234 = vector.extract_strided_slice %230 {offsets = [0, 64], sizes = [2, 32], strides = [1, 1]} : vector<2x128xf32> to vector<2x32xf32>
    %235 = arith.mulf %233, %234 : vector<2x32xf32>
    %236 = arith.addf %232, %235 : vector<2x32xf32>
    %237 = vector.extract_strided_slice %230 {offsets = [0, 96], sizes = [2, 32], strides = [1, 1]} : vector<2x128xf32> to vector<2x32xf32>
    %238 = math.tanh %236 : vector<2x32xf32>
    %239 = arith.mulf %237, %238 : vector<2x32xf32>
    %240 = vector.broadcast %6 : vector<1x128xf32> to vector<2x128xf32>
    %241 = arith.addf %223, %240 : vector<2x128xf32>
    %cst_45 = arith.constant dense<0.000000e+00> : vector<2x128xf32>
    %242 = tpu.matmul %239, %2, %cst_45 {dimension_numbers = #tpu.dot_dimension_numbers<[1], [0], [0], [1], [0, 0, 1, 1], [], []>} : vector<2x32xf32>, vector<32x128xf32>, vector<2x128xf32> -> vector<2x128xf32>
    %243 = arith.addf %241, %242 : vector<2x128xf32>
    %244 = arith.mulf %243, %25 : vector<2x128xf32>
    %245 = math.tanh %244 : vector<2x128xf32>
    %246 = arith.mulf %245, %28 : vector<2x128xf32>
    %247 = arith.addf %246, %31 : vector<2x128xf32>
    %248 = vector.extract_strided_slice %247 {offsets = [0, 32], sizes = [2, 32], strides = [1, 1]} : vector<2x128xf32> to vector<2x32xf32>
    %249 = arith.mulf %248, %215 : vector<2x32xf32>
    %250 = vector.extract_strided_slice %247 {offsets = [0, 0], sizes = [2, 32], strides = [1, 1]} : vector<2x128xf32> to vector<2x32xf32>
    %251 = vector.extract_strided_slice %247 {offsets = [0, 64], sizes = [2, 32], strides = [1, 1]} : vector<2x128xf32> to vector<2x32xf32>
    %252 = arith.mulf %250, %251 : vector<2x32xf32>
    %253 = arith.addf %249, %252 : vector<2x32xf32>
    %254 = vector.extract_strided_slice %247 {offsets = [0, 96], sizes = [2, 32], strides = [1, 1]} : vector<2x128xf32> to vector<2x32xf32>
    %255 = math.tanh %253 : vector<2x32xf32>
    %256 = arith.mulf %254, %255 : vector<2x32xf32>
    %cst_46 = arith.constant dense<0.000000e+00> : vector<2x128xf32>
    %257 = tpu.matmul %256, %4, %cst_46 {dimension_numbers = #tpu.dot_dimension_numbers<[1], [0], [0], [1], [0, 0, 1, 1], [], []>} : vector<2x32xf32>, vector<32x128xf32>, vector<2x128xf32> -> vector<2x128xf32>
    %258 = vector.broadcast %7 : vector<1x128xf32> to vector<2x128xf32>
    %259 = arith.addf %257, %258 : vector<2x128xf32>
    %c0_47 = arith.constant 0 : index
    %c640 = arith.constant 640 : index
    %260 = vector.load %arg3[%c0_47, %c640] : memref<2x1024xf32, #tpu.memory_space<vmem>>, vector<2x128xf32>
    tpu.vector_store %arg3[%c0_47, %c640], %259 {strides = array<i32>} : memref<2x1024xf32, #tpu.memory_space<vmem>>, vector<2x128xf32>,
    %cst_48 = arith.constant dense<0.000000e+00> : vector<2x128xf32>
    %261 = tpu.matmul %256, %3, %cst_48 {dimension_numbers = #tpu.dot_dimension_numbers<[1], [0], [0], [1], [0, 0, 1, 1], [], []>} : vector<2x32xf32>, vector<32x128xf32>, vector<2x128xf32> -> vector<2x128xf32>
    %262 = vector.extract_strided_slice %16 {offsets = [12, 0], sizes = [2, 128], strides = [1, 1]} : vector<16x128xf32> to vector<2x128xf32>
    %cst_49 = arith.constant dense<0.000000e+00> : vector<2x128xf32>
    %263 = tpu.matmul %239, %1, %cst_49 {dimension_numbers = #tpu.dot_dimension_numbers<[1], [0], [0], [1], [0, 0, 1, 1], [], []>} : vector<2x32xf32>, vector<32x128xf32>, vector<2x128xf32> -> vector<2x128xf32>
    %264 = arith.addf %262, %263 : vector<2x128xf32>
    %265 = arith.mulf %264, %25 : vector<2x128xf32>
    %266 = math.tanh %265 : vector<2x128xf32>
    %267 = arith.mulf %266, %28 : vector<2x128xf32>
    %268 = arith.addf %267, %31 : vector<2x128xf32>
    %269 = vector.extract_strided_slice %268 {offsets = [0, 32], sizes = [2, 32], strides = [1, 1]} : vector<2x128xf32> to vector<2x32xf32>
    %270 = arith.mulf %269, %236 : vector<2x32xf32>
    %271 = vector.extract_strided_slice %268 {offsets = [0, 0], sizes = [2, 32], strides = [1, 1]} : vector<2x128xf32> to vector<2x32xf32>
    %272 = vector.extract_strided_slice %268 {offsets = [0, 64], sizes = [2, 32], strides = [1, 1]} : vector<2x128xf32> to vector<2x32xf32>
    %273 = arith.mulf %271, %272 : vector<2x32xf32>
    %274 = arith.addf %270, %273 : vector<2x32xf32>
    %275 = vector.extract_strided_slice %268 {offsets = [0, 96], sizes = [2, 32], strides = [1, 1]} : vector<2x128xf32> to vector<2x32xf32>
    %276 = math.tanh %274 : vector<2x32xf32>
    %277 = arith.mulf %275, %276 : vector<2x32xf32>
    %278 = vector.broadcast %6 : vector<1x128xf32> to vector<2x128xf32>
    %279 = arith.addf %261, %278 : vector<2x128xf32>
    %cst_50 = arith.constant dense<0.000000e+00> : vector<2x128xf32>
    %280 = tpu.matmul %277, %2, %cst_50 {dimension_numbers = #tpu.dot_dimension_numbers<[1], [0], [0], [1], [0, 0, 1, 1], [], []>} : vector<2x32xf32>, vector<32x128xf32>, vector<2x128xf32> -> vector<2x128xf32>
    %281 = arith.addf %279, %280 : vector<2x128xf32>
    %282 = arith.mulf %281, %25 : vector<2x128xf32>
    %283 = math.tanh %282 : vector<2x128xf32>
    %284 = arith.mulf %283, %28 : vector<2x128xf32>
    %285 = arith.addf %284, %31 : vector<2x128xf32>
    %286 = vector.extract_strided_slice %285 {offsets = [0, 32], sizes = [2, 32], strides = [1, 1]} : vector<2x128xf32> to vector<2x32xf32>
    %287 = arith.mulf %286, %253 : vector<2x32xf32>
    %288 = vector.extract_strided_slice %285 {offsets = [0, 0], sizes = [2, 32], strides = [1, 1]} : vector<2x128xf32> to vector<2x32xf32>
    %289 = vector.extract_strided_slice %285 {offsets = [0, 64], sizes = [2, 32], strides = [1, 1]} : vector<2x128xf32> to vector<2x32xf32>
    %290 = arith.mulf %288, %289 : vector<2x32xf32>
    %291 = arith.addf %287, %290 : vector<2x32xf32>
    %292 = vector.extract_strided_slice %285 {offsets = [0, 96], sizes = [2, 32], strides = [1, 1]} : vector<2x128xf32> to vector<2x32xf32>
    %293 = math.tanh %291 : vector<2x32xf32>
    %294 = arith.mulf %292, %293 : vector<2x32xf32>
    %cst_51 = arith.constant dense<0.000000e+00> : vector<2x128xf32>
    %295 = tpu.matmul %294, %4, %cst_51 {dimension_numbers = #tpu.dot_dimension_numbers<[1], [0], [0], [1], [0, 0, 1, 1], [], []>} : vector<2x32xf32>, vector<32x128xf32>, vector<2x128xf32> -> vector<2x128xf32>
    %296 = vector.broadcast %7 : vector<1x128xf32> to vector<2x128xf32>
    %297 = arith.addf %295, %296 : vector<2x128xf32>
    %c0_52 = arith.constant 0 : index
    %c768 = arith.constant 768 : index
    %298 = vector.load %arg3[%c0_52, %c768] : memref<2x1024xf32, #tpu.memory_space<vmem>>, vector<2x128xf32>
    tpu.vector_store %arg3[%c0_52, %c768], %297 {strides = array<i32>} : memref<2x1024xf32, #tpu.memory_space<vmem>>, vector<2x128xf32>,
    %cst_53 = arith.constant dense<0.000000e+00> : vector<2x128xf32>
    %299 = tpu.matmul %294, %3, %cst_53 {dimension_numbers = #tpu.dot_dimension_numbers<[1], [0], [0], [1], [0, 0, 1, 1], [], []>} : vector<2x32xf32>, vector<32x128xf32>, vector<2x128xf32> -> vector<2x128xf32>
    %300 = vector.extract_strided_slice %16 {offsets = [14, 0], sizes = [2, 128], strides = [1, 1]} : vector<16x128xf32> to vector<2x128xf32>
    %cst_54 = arith.constant dense<0.000000e+00> : vector<2x128xf32>
    %301 = tpu.matmul %277, %1, %cst_54 {dimension_numbers = #tpu.dot_dimension_numbers<[1], [0], [0], [1], [0, 0, 1, 1], [], []>} : vector<2x32xf32>, vector<32x128xf32>, vector<2x128xf32> -> vector<2x128xf32>
    %302 = arith.addf %300, %301 : vector<2x128xf32>
    %303 = arith.mulf %302, %25 : vector<2x128xf32>
    %304 = math.tanh %303 : vector<2x128xf32>
    %305 = arith.mulf %304, %28 : vector<2x128xf32>
    %306 = arith.addf %305, %31 : vector<2x128xf32>
    %307 = vector.extract_strided_slice %306 {offsets = [0, 32], sizes = [2, 32], strides = [1, 1]} : vector<2x128xf32> to vector<2x32xf32>
    %308 = arith.mulf %307, %274 : vector<2x32xf32>
    %309 = vector.extract_strided_slice %306 {offsets = [0, 0], sizes = [2, 32], strides = [1, 1]} : vector<2x128xf32> to vector<2x32xf32>
    %310 = vector.extract_strided_slice %306 {offsets = [0, 64], sizes = [2, 32], strides = [1, 1]} : vector<2x128xf32> to vector<2x32xf32>
    %311 = arith.mulf %309, %310 : vector<2x32xf32>
    %312 = arith.addf %308, %311 : vector<2x32xf32>
    %313 = vector.extract_strided_slice %306 {offsets = [0, 96], sizes = [2, 32], strides = [1, 1]} : vector<2x128xf32> to vector<2x32xf32>
    %314 = math.tanh %312 : vector<2x32xf32>
    %315 = arith.mulf %313, %314 : vector<2x32xf32>
    %316 = vector.broadcast %6 : vector<1x128xf32> to vector<2x128xf32>
    %317 = arith.addf %299, %316 : vector<2x128xf32>
    %cst_55 = arith.constant dense<0.000000e+00> : vector<2x128xf32>
    %318 = tpu.matmul %315, %2, %cst_55 {dimension_numbers = #tpu.dot_dimension_numbers<[1], [0], [0], [1], [0, 0, 1, 1], [], []>} : vector<2x32xf32>, vector<32x128xf32>, vector<2x128xf32> -> vector<2x128xf32>
    %319 = arith.addf %317, %318 : vector<2x128xf32>
    %320 = arith.mulf %319, %25 : vector<2x128xf32>
    %321 = math.tanh %320 : vector<2x128xf32>
    %322 = arith.mulf %321, %28 : vector<2x128xf32>
    %323 = arith.addf %322, %31 : vector<2x128xf32>
    %324 = vector.extract_strided_slice %323 {offsets = [0, 32], sizes = [2, 32], strides = [1, 1]} : vector<2x128xf32> to vector<2x32xf32>
    %325 = arith.mulf %324, %291 : vector<2x32xf32>
    %326 = vector.extract_strided_slice %323 {offsets = [0, 0], sizes = [2, 32], strides = [1, 1]} : vector<2x128xf32> to vector<2x32xf32>
    %327 = vector.extract_strided_slice %323 {offsets = [0, 64], sizes = [2, 32], strides = [1, 1]} : vector<2x128xf32> to vector<2x32xf32>
    %328 = arith.mulf %326, %327 : vector<2x32xf32>
    %329 = arith.addf %325, %328 : vector<2x32xf32>
    %330 = vector.extract_strided_slice %323 {offsets = [0, 96], sizes = [2, 32], strides = [1, 1]} : vector<2x128xf32> to vector<2x32xf32>
    %331 = math.tanh %329 : vector<2x32xf32>
    %332 = arith.mulf %330, %331 : vector<2x32xf32>
    %cst_56 = arith.constant dense<0.000000e+00> : vector<2x128xf32>
    %333 = tpu.matmul %332, %4, %cst_56 {dimension_numbers = #tpu.dot_dimension_numbers<[1], [0], [0], [1], [0, 0, 1, 1], [], []>} : vector<2x32xf32>, vector<32x128xf32>, vector<2x128xf32> -> vector<2x128xf32>
    %334 = vector.broadcast %7 : vector<1x128xf32> to vector<2x128xf32>
    %335 = arith.addf %333, %334 : vector<2x128xf32>
    %c0_57 = arith.constant 0 : index
    %c896 = arith.constant 896 : index
    %336 = vector.load %arg3[%c0_57, %c896] : memref<2x1024xf32, #tpu.memory_space<vmem>>, vector<2x128xf32>
    tpu.vector_store %arg3[%c0_57, %c896], %335 {strides = array<i32>} : memref<2x1024xf32, #tpu.memory_space<vmem>>, vector<2x128xf32>,
    %c0_58 = arith.constant 0 : index
    %c0_59 = arith.constant 0 : index
    %c0_60 = arith.constant 0 : index
    %337 = vector.load %arg4[%c0_58, %c0_59, %c0_60] : memref<2x2x32xf32, #tpu.memory_space<vmem>>, vector<1x2x32xf32>
    %338 = vector.shape_cast %337 : vector<1x2x32xf32> to vector<2x32xf32>
    %339 = vector.shape_cast %315 : vector<2x32xf32> to vector<1x2x32xf32>
    tpu.vector_store %arg4[%c0_58, %c0_59, %c0_60], %339 {strides = array<i32>} : memref<2x2x32xf32, #tpu.memory_space<vmem>>, vector<1x2x32xf32>,
    %c1 = arith.constant 1 : index
    %c0_61 = arith.constant 0 : index
    %c0_62 = arith.constant 0 : index
    %340 = vector.load %arg4[%c1, %c0_61, %c0_62] : memref<2x2x32xf32, #tpu.memory_space<vmem>>, vector<1x2x32xf32>
    %341 = vector.shape_cast %340 : vector<1x2x32xf32> to vector<2x32xf32>
    %342 = vector.shape_cast %332 : vector<2x32xf32> to vector<1x2x32xf32>
    tpu.vector_store %arg4[%c1, %c0_61, %c0_62], %342 {strides = array<i32>} : memref<2x2x32xf32, #tpu.memory_space<vmem>>, vector<1x2x32xf32>,
    %c0_63 = arith.constant 0 : index
    %c0_64 = arith.constant 0 : index
    %c0_65 = arith.constant 0 : index
    %343 = vector.load %arg5[%c0_63, %c0_64, %c0_65] : memref<2x2x32xf32, #tpu.memory_space<vmem>>, vector<1x2x32xf32>
    %344 = vector.shape_cast %343 : vector<1x2x32xf32> to vector<2x32xf32>
    %345 = vector.shape_cast %312 : vector<2x32xf32> to vector<1x2x32xf32>
    tpu.vector_store %arg5[%c0_63, %c0_64, %c0_65], %345 {strides = array<i32>} : memref<2x2x32xf32, #tpu.memory_space<vmem>>, vector<1x2x32xf32>,
    %c1_66 = arith.constant 1 : index
    %c0_67 = arith.constant 0 : index
    %c0_68 = arith.constant 0 : index
    %346 = vector.load %arg5[%c1_66, %c0_67, %c0_68] : memref<2x2x32xf32, #tpu.memory_space<vmem>>, vector<1x2x32xf32>
    %347 = vector.shape_cast %346 : vector<1x2x32xf32> to vector<2x32xf32>
    %348 = vector.shape_cast %329 : vector<2x32xf32> to vector<1x2x32xf32>
    tpu.vector_store %arg5[%c1_66, %c0_67, %c0_68], %348 {strides = array<i32>} : memref<2x2x32xf32, #tpu.memory_space<vmem>>, vector<1x2x32xf32>,
    return
  }
  func.func @transform_0(%arg0: i32) -> (i32, i32) {
    %c0_i32 = arith.constant 0 : i32
    %c0_i32_0 = arith.constant 0 : i32
    %c0_i32_1 = arith.constant 0 : i32
    return %c0_i32, %c0_i32_0 : i32, i32
  }
  func.func @transform_1(%arg0: i32) -> (i32, i32) {
    %c0_i32 = arith.constant 0 : i32
    %c0_i32_0 = arith.constant 0 : i32
    %c0_i32_1 = arith.constant 0 : i32
    return %c0_i32, %c0_i32_0 : i32, i32
  }
  func.func @transform_2(%arg0: i32) -> (i32, i32) {
    %c0_i32 = arith.constant 0 : i32
    %c0_i32_0 = arith.constant 0 : i32
    %c0_i32_1 = arith.constant 0 : i32
    return %c0_i32, %c0_i32_0 : i32, i32
  }
  func.func @transform_3(%arg0: i32) -> (i32, i32, i32) {
    %c0_i32 = arith.constant 0 : i32
    %c0_i32_0 = arith.constant 0 : i32
    %c0_i32_1 = arith.constant 0 : i32
    %c0_i32_2 = arith.constant 0 : i32
    return %c0_i32, %c0_i32_0, %c0_i32_1 : i32, i32, i32
  }
  func.func @transform_4(%arg0: i32) -> (i32, i32, i32) {
    %c0_i32 = arith.constant 0 : i32
    %c0_i32_0 = arith.constant 0 : i32
    %c0_i32_1 = arith.constant 0 : i32
    %c0_i32_2 = arith.constant 0 : i32
    return %c0_i32, %c0_i32_0, %c0_i32_1 : i32, i32, i32
  }
}

</mosaic_0001>

<bundles_post_ra>
// kernel: lstm_forward.1
= control target key start
LH: loop header
LB: loop body
LE: loop exit
PB: predicated region body
PF: predicated region fallthrough
CT: control target
= control target key end

     0   :  { %10 = vsyncpa [#allocation3], 0  ;;  %s4378_s0 = inlined_call_operand.vmem [shape: s32[16,1], index: 0, kind: input, shape index: {}]   ;;  %s4379_s1 = inlined_call_operand.hbm [shape: f32[160,128], index: 1, kind: input, shape index: {}]   ;;  %s4380_s2 = inlined_call_operand.vmem [shape: f32[2,1024], index: 2, kind: output, shape index: {0}]   ;;  %s4381_s3 = inlined_call_operand.hbm [shape: f32[2,2,32], index: 3, kind: output, shape index: {1}]   ;;  %s4382_s4 = inlined_call_operand.hbm [shape: f32[2,2,32], index: 4, kind: output, shape index: {2}]  }
   0x1   :  { %11 = vsyncpa [#allocation4], 0 }
   0x2   :  { %12 = vsyncpa [#allocation7], 0  ;;  %s3678_s15 = smov [#allocation2]  }
   0x3   :  { %s20_s16 = sshll.u32 %s3678_s15, 4  ;;  %s21_s16 = int_to_ptr.vmem [resolvable:$true] %s20_s16 }
   0x4   :  { %s3620_s17 = scalar_lea.vmem %s21_s16, 2560  ;;  %p3625_p1 = scmp.lt.s32.totalorder %s21_s16, %s21_s16 }
   0x5   :  { %p3621_p0 = scmp.ne.s32.totalorder %s21_s16, %s3620_s17  ;;  %p3626_p2 = scmp.lt.s32.totalorder %s3620_s17, %s3620_s17 }
   0x7   :  { %p3627_p3 = por %p3626_p2, %p3625_p1 }
   0x9   :  { %p3628_p4 = pnand %p3627_p3, %p3621_p0 }
   0xb   :  { %3631 = shalt.err (!%p3628_p4)
}
   0xc   :  { %s3679_s18 = smov 128   ;;  %s3680_s19 = smov 8  }
   0xd   :  { %26 = dma.hbm_to_vmem [thread:$0]  %s4379_s1, 2560, %s21_s16, [#allocation3], %s3679_s18, %s3679_s18, %s3680_s19  }
   0xe   :  { %3672 = dma.done.wait [#allocation3], 2560  }
   0xf   :  { %3673 = vsyncadd [#allocation3], 4294964736  ;;  %v3681_v0 = vmov 0   ;;  %v3682_v1 = vmov 0.0   ;;  %v52_v2 = vld [vmem:[%s4378_s0] sm:$0xff]  ;;  %v32_v3 = vld [vmem:[#allocation2 + $0x10] sm:$0xff]  ;;  %v54_v11 = vlaneseq }
  0x10   :  { %3529 = vset.pattern.permute.xlu0 %v3681_v0  ;;  %3164 = vmatprep.subr.mxu1 %v3682_v1  ;;  %v3723_v4 = vld [vmem:[#allocation2 + $0x30] sm:$0xff]  ;;  %v31_v5 = vld [vmem:[#allocation2 + $0x8] sm:$0xff]  ;;  %v30_v8 = vld [vmem:[#allocation2] sm:$0xff]  ;;  %vm3683_vm0 = vmmov 0   ;;  %vm72_vm1 = vcmask 195584   ;;  %v3684_v24 = vmov 0.5  }
  0x11   :  { %57 = vperm.xlu0 %3529, %v52_v2   ;;  %3155 = vmatprep.subr.mxu0 %v32_v3  ;;  %v3725_v6 = vld [vmem:[#allocation2 + $0x28] sm:$0xff]  ;;  %v3733_v9 = vld [vmem:[#allocation2 + $0x20] sm:$0xff]  ;;  %v3736_v10 = vld [vmem:[#allocation2 + $0x18] sm:$0xff]  ;;  %v55_v12 = vand.u32 127, %v54_v11  ;;  %s3686_s25 = smov 32   ;;  %vm159_vm7 = vcmask 261120  }
  0x12   :  { %v53_v7 = vld [vmem:[%s4378_s0 + $0x8] sm:$0xff]  ;;  %3156 = vmatpush3.msra.mxu0 %v32_v3  ;;  %3165 = vmatpush3.msra.mxu1 %v3723_v4  ;;  %v2955_v19 = vld [vmem:[#allocation2 + $0x98] ss:$0 sm:$0xff]  ;;  %s3685_s0 = smov 64   ;;  %v3769_v37 = vld [vmem:[#allocation2 + $0x70] sm:$0xff]  ;;  %s3687_s14 = smov 96  }
  0x13   :  { %3157 = vmatprep.subr.mxu0 %v31_v5  ;;  %3166 = vmatprep.subr.mxu1 %v3682_v1  ;;  %vm154_vm4 = vcmp.ge.s32.totalorder %v55_v12, 64  ;;  %vm155_vm5 = vcmp.lt.s32.totalorder %v55_v12, 96  ;;  %v3771_v38 = vld [vmem:[#allocation2 + $0x50] sm:$0xff]  ;;  %v3773_v39 = vld [vmem:[#allocation2 + $0x68] sm:$0xff]  ;;  %v3781_v41 = vld [vmem:[#allocation2 + $0x60] sm:$0xff]  ;;  %vm2899_vm8 = vcmask 261126  }
  0x14   :  { %3158 = vmatpush3.msra.mxu0 %v31_v5  ;;  %3167 = vmatpush3.msra.mxu1 %v3725_v6  ;;  %vm156_vm6 = vmand %vm154_vm4, %vm155_vm5  ;;  %v3777_v40 = vld [vmem:[#allocation2 + $0x48] sm:$0xff]  ;;  %v3783_v42 = vld [vmem:[#allocation2 + $0x40] sm:$0xff]  ;;  %vm2903_vm9 = vcmask 254976   ;;  %s3688_s15 = smov [#allocation5]   ;;  %s3689_s17 = smov [#allocation6]  }
  0x15   :  { %60 = vperm.xlu0 %3529, %v53_v7   ;;  %3159 = vmatprep.subr.mxu0 %v30_v8  ;;  %v3756_v25 = vsel %vm156_vm6, 1.0, %v3684_v24  ;;  %v3760_v29 = vsel %vm156_vm6, 0.0, %v3684_v24  ;;  %v3789_v43 = vld [vmem:[#allocation2 + $0x58] sm:$0xff]  ;;  %v3852_v24 = vld [vmem:[#allocation2 + $0x88] sm:$0xff]  ;;  %s2923_s16 = sshll.u32 %s3688_s15, 4  ;;  %s2935_s18 = sshll.u32 %s3689_s17, 4  ;;  %s2924_s16 = int_to_ptr.vmem [resolvable:$true] %s2923_s16  ;;  %s2936_s18 = int_to_ptr.vmem [resolvable:$true] %s2935_s18 }
  0x16   :  { %3168 = vmatprep.subr.mxu1 %v3682_v1  ;;  %3160 = vmatpush3.msra.mxu0 %v30_v8  ;;  %v3791_v44 = vld [vmem:[#allocation2 + $0x38] sm:$0xff]  ;;  %s3632_s19 = scalar_lea.vmem %s2924_s16, 64  ;;  %p3637_p6 = scmp.lt.s32.totalorder %s2924_s16, %s2924_s16 }
  0x17   :  { %3169 = vmatpush3.msra.mxu1 %v3733_v9  ;;  %3172 = vmatprep.mubr.msk.f32.mxu1 %vm3683_vm0, %v3682_v1  ;;  %v3828_v51 = vld [vmem:[#allocation2 + $0x99] ss:$0 sm:$0xff]  ;;  %p3633_p5 = scmp.ne.s32.totalorder %s2924_s16, %s3632_s19  ;;  %p3638_p7 = scmp.lt.s32.totalorder %s3632_s19, %s3632_s19 }
  0x18   :  { %3170 = vmatprep.subr.mxu1 %v3682_v1  ;;  %3175 = vmatprep.subr.mxu0 %v3682_v1 }
  0x19   :  { %3171 = vmatpush3.msra.mxu1 %v3736_v10  ;;  %p3639_p8 = por %p3638_p7, %p3637_p6 }
  0x1a   :  { %3173 = vmatmul.mubr.f32.vlgmr.msra.gmra.mxu1 %v3682_v1  ;;  %3186 = vmatprep.subr.mxu1 %v3682_v1 }
  0x1b   :  { %3194 = vmatprep.mubr.msk.f32.mxu1 %vm3683_vm0, %v3682_v1  ;;  %3187 = vmatpush3.msra.mxu1 %v3771_v38  ;;  %p3640_p9 = pnand %p3639_p8, %p3633_p5 }
  0x1c   :  { %3188 = vmatprep.subr.mxu1 %v3682_v1 }
  0x1d   :  { %3189 = vmatpush3.msra.mxu1 %v3777_v40 }
  0x1e   :  { %3190 = vmatprep.subr.mxu1 %v3682_v1 }
  0x1f   :  { %3191 = vmatpush3.msra.mxu1 %v3783_v42 }
  0x20   :  { %3192 = vmatprep.subr.mxu1 %v3682_v1 }
  0x21   :  { %3193 = vmatpush3.msra.mxu1 %v3791_v44 }
  0x22   :  { %3208 = vmatprep.subr.mxu1 %v3682_v1 }
  0x8c   :  { %v58_v13 = vpop.permute.xlu0 %57 }
  0x8d   :  { %vm62_vm2 = vcmp.eq.s32.totalorder %v55_v12, %v58_v13 }
  0x8e   :  { %v2953_v14 = vsel %vm62_vm2, 1.0, %v3682_v1 }
  0x8f   :  { %3161 = vmatprep.mubr.msk.f32.mxu0 %vm72_vm1, %v2953_v14 }
  0x90   :  { %v61_v15 = vpop.permute.xlu0 %60 }
  0x91   :  { %vm63_vm3 = vcmp.eq.s32.totalorder %v55_v12, %v61_v15 }
  0x92   :  { %v2954_v16 = vsel %vm63_vm3, 1.0, %v3682_v1 }
  0x93   :  { %3162 = vmatmul.mubr.msk.f32.vlgmr.msra.gmra.mxu0 %vm72_vm1, %v2954_v16 }
  0x94   :  { %3183 = vmatprep.mubr.msk.f32.mxu0 %vm3683_vm0, %v3682_v1  ;;  %3176 = vmatpush3.msra.mxu0 %v3769_v37 }
  0x95   :  { %3177 = vmatprep.subr.mxu0 %v3682_v1 }
  0x96   :  { %3178 = vmatpush3.msra.mxu0 %v3773_v39 }
  0x97   :  { %3179 = vmatprep.subr.mxu0 %v3682_v1 }
  0x98   :  { %3180 = vmatpush3.msra.mxu0 %v3781_v41 }
  0x99   :  { %3181 = vmatprep.subr.mxu0 %v3682_v1 }
  0x9a   :  { %3182 = vmatpush3.msra.mxu0 %v3789_v43 }
  0x9b   :  { %3184 = vmatmul.mubr.f32.vlgmr.msra.gmra.mxu0 %v3682_v1  ;;  %3197 = vmatprep.subr.mxu0 %v3682_v1 }
  0x9c   :  { %3205 = vmatprep.mubr.msk.f32.mxu0 %vm3683_vm0, %v3682_v1 }
  0xda   :  { %v229_v17 = vpop.f32.mrf.mxu1 }
  0xdc   :  { %v3174_v18 = vpop.f32.mrf.mxu1 }
 0x153   :  { %v3163_v20 = vpop.f32.mrf.mxu0 }
 0x154   :  { %v3752_v21 = vadd.f32 %v3163_v20, %v2955_v19 }
 0x155   :  { %v145_v22 = vpop.f32.mrf.mxu0 }
 0x156   :  { %v3754_v23 = vadd.f32 %v2955_v19, %v145_v22  ;;  %v3850_v22 = vld [vmem:[#allocation2 + $0x90] sm:$0xff] }
 0x157   :  { %3198 = vmatpush3.msra.mxu0 %v3850_v22 }
 0x158   :  { %v233_v26 = vadd.f32 %v229_v17, %v3754_v23  ;;  %3199 = vmatprep.subr.mxu0 %v3682_v1 }
 0x159   :  { %3200 = vmatpush3.msra.mxu0 %v3852_v24 }
 0x15a   :  { %v234_v27 = vmul.f32 %v233_v26, %v3756_v25  ;;  %v3856_v26 = vld [vmem:[#allocation2 + $0x80] sm:$0xff]  ;;  %3201 = vmatprep.subr.mxu0 %v3682_v1 }
 0x15b   :  { %v325_v48 = vpop.f32.mrf.mxu0  ;;  %3202 = vmatpush3.msra.mxu0 %v3856_v26 }
 0x15c   :  { %3530 = vtanh.f32 %v234_v27  ;;  %v326_v52 = vadd.f32 %v3828_v51, %v325_v48  ;;  %v3860_v27 = vld [vmem:[#allocation2 + $0x78] sm:$0xff]  ;;  %3203 = vmatprep.subr.mxu0 %v3682_v1 }
 0x15d   :  { %v3185_v49 = vpop.f32.mrf.mxu0  ;;  %3204 = vmatpush3.msra.mxu0 %v3860_v27 }
 0x15e   :  { %3219 = vmatprep.subr.mxu0 %v3682_v1 }
 0x169   :  { %v3531_v28 = vpop.eup %3530 }
 0x16a   :  { %v236_v30 = vmul.f32 %v3531_v28, %v3756_v25 }
 0x16c   :  { %v237_v31 = vadd.f32 %v236_v30, %v3760_v29 }
 0x16e   :  { %240 = vrot.lane.b32.xlu1 %v237_v31, %s3685_s0  ;;  %v238_v34 = vmul.f32 0.0, %v237_v31 }
 0x1e0   :  { %v241_v32 = vpop.permute.xlu1 %240 }
 0x1e1   :  { %v243_v33 = vmul.f32 %v241_v32, %v237_v31 }
 0x1e3   :  { %245 = vrot.lane.b32.xlu1 %v243_v33, %s3686_s25 }
 0x255   :  { %v246_v35 = vpop.permute.xlu1 %245 }
 0x256   :  { %v3766_v36 = vadd.f32 %v246_v35, %v238_v34 }
 0x258   :  { %3532 = vtanh.f32 %v3766_v36  ;;  %v585_v16 = vrot.slane %v3766_v36, 6 }
 0x265   :  { %v3533_v45 = vpop.eup %3532 }
 0x266   :  { %251 = vrot.lane.b32.xlu0 %v3533_v45, %s3685_s0  ;;  %v3913_v45 = vld [vmem:[#allocation2 + $0x9a] ss:$0 sm:$0xff] }
 0x2d8   :  { %v252_v46 = vpop.permute.xlu0 %251 }
 0x2d9   :  { %v254_v47 = vmul.f32 %v252_v46, %v237_v31 }
 0x2db   :  { %330 = vrot.lane.b32.xlu1 %v254_v47, %s3686_s25 }
 0x34d   :  { %v331_v50 = vpop.permute.xlu1 %330 }
 0x34e   :  { %3195 = vmatmul.mubr.msk.f32.vlgmr.msra.gmra.mxu1 %vm159_vm7, %v331_v50 }
 0x34f   :  { %3209 = vmatpush3.msra.mxu1 %v3723_v4  ;;  %3216 = vmatprep.mubr.msk.f32.mxu1 %vm3683_vm0, %v3682_v1 }
 0x350   :  { %3210 = vmatprep.subr.mxu1 %v3682_v1 }
 0x351   :  { %3211 = vmatpush3.msra.mxu1 %v3725_v6 }
 0x352   :  { %3212 = vmatprep.subr.mxu1 %v3682_v1 }
 0x353   :  { %3213 = vmatpush3.msra.mxu1 %v3733_v9 }
 0x354   :  { %3214 = vmatprep.subr.mxu1 %v3682_v1 }
 0x355   :  { %3215 = vmatpush3.msra.mxu1 %v3736_v10 }
 0x356   :  { %3217 = vmatmul.mubr.msk.f32.vlgmr.msra.gmra.mxu1 %vm159_vm7, %v331_v50  ;;  %3230 = vmatprep.subr.mxu1 %v3682_v1 }
 0x357   :  { %3231 = vmatpush3.msra.mxu1 %v3771_v38  ;;  %3238 = vmatprep.mubr.msk.f32.mxu1 %vm3683_vm0, %v3682_v1 }
 0x358   :  { %3232 = vmatprep.subr.mxu1 %v3682_v1 }
 0x359   :  { %3233 = vmatpush3.msra.mxu1 %v3777_v40 }
 0x35a   :  { %3234 = vmatprep.subr.mxu1 %v3682_v1 }
 0x35b   :  { %3235 = vmatpush3.msra.mxu1 %v3783_v42 }
 0x35c   :  { %3236 = vmatprep.subr.mxu1 %v3682_v1 }
 0x35d   :  { %3237 = vmatpush3.msra.mxu1 %v3791_v44 }
 0x35e   :  { %3252 = vmatprep.subr.mxu1 %v3682_v1 }
 0x40e   :  { %v400_v53 = vpop.f32.mrf.mxu1 }
 0x40f   :  { %v404_v54 = vadd.f32 %v400_v53, %v326_v52 }
 0x410   :  { %v3196_v55 = vpop.f32.mrf.mxu1 }
 0x411   :  { %v405_v56 = vmul.f32 %v404_v54, %v3756_v25 }
 0x413   :  { %3534 = vtanh.f32 %v405_v56 }
 0x416   :  { %v572_v57 = vpop.f32.mrf.mxu1 }
 0x417   :  { %v577_v58 = vrot.slane %v572_v57, 6 }
 0x418   :  { %v3218_v59 = vpop.f32.mrf.mxu1 }
 0x419   :  { %v579_v60 = vadd.f32 %v577_v58, %v3754_v23 }
 0x41b   :  { %v580_v61 = vmul.f32 %v579_v60, %v3756_v25 }
 0x41d   :  { %3536 = vtanh.f32 %v580_v61 }
 0x420   :  { %v3535_v62 = vpop.eup %3534 }
 0x421   :  { %v407_v63 = vmul.f32 %v3535_v62, %v3756_v25 }
 0x423   :  { %v408_v0 = vadd.f32 %v407_v63, %v3760_v29 }
 0x425   :  { %411 = vrot.lane.b32.xlu1 %v408_v0, %s3685_s0  ;;  %v409_v13 = vmul.f32 0.0, %v408_v0 }
 0x42a   :  { %v3537_v2 = vpop.eup %3536 }
 0x42b   :  { %v582_v3 = vmul.f32 %v3537_v2, %v3756_v25 }
 0x42d   :  { %v583_v5 = vadd.f32 %v582_v3, %v3760_v29 }
 0x42f   :  { %589 = vrot.lane.b32.xlu0 %v583_v5, %s3685_s0  ;;  %v587_v17 = vmul.f32 %v585_v16, %v583_v5 }
 0x497   :  { %v412_v7 = vpop.permute.xlu1 %411 }
 0x498   :  { %v414_v8 = vmul.f32 %v412_v7, %v408_v0 }
 0x49a   :  { %416 = vrot.lane.b32.xlu1 %v414_v8, %s3686_s25 }
 0x4a1   :  { %v590_v11 = vpop.permute.xlu0 %589 }
 0x4a2   :  { %v592_v12 = vmul.f32 %v590_v11, %v583_v5 }
 0x4a4   :  { %594 = vrot.lane.b32.xlu0 %v592_v12, %s3686_s25 }
 0x50c   :  { %v417_v14 = vpop.permute.xlu1 %416 }
 0x50d   :  { %v3842_v15 = vadd.f32 %v417_v14, %v409_v13 }
 0x50f   :  { %3538 = vtanh.f32 %v3842_v15 }
 0x516   :  { %v595_v18 = vpop.permute.xlu0 %594 }
 0x517   :  { %v3846_v19 = vadd.f32 %v595_v18, %v587_v17 }
 0x519   :  { %3540 = vtanh.f32 %v3846_v19  ;;  %v927_v17 = vrot.slane %v3846_v19, 6 }
 0x51c   :  { %v3539_v20 = vpop.eup %3538 }
 0x51d   :  { %422 = vrot.lane.b32.xlu1 %v3539_v20, %s3685_s0 }
 0x526   :  { %v3541_v28 = vpop.eup %3540 }
 0x527   :  { %600 = vrot.lane.b32.xlu0 %v3541_v28, %s3685_s0 }
 0x58f   :  { %v423_v30 = vpop.permute.xlu1 %422 }
 0x590   :  { %v425_v31 = vmul.f32 %v423_v30, %v408_v0 }
 0x592   :  { %431 = vrot.lane.b32.xlu0 %v425_v31, %s3686_s25 }
 0x599   :  { %v601_v32 = vpop.permute.xlu0 %600 }
 0x59a   :  { %v603_v33 = vmul.f32 %v601_v32, %v583_v5 }
 0x59c   :  { %v675_v34 = vrot.slane %v603_v33, 2 }
 0x59e   :  { %676 = vrot.lane.b32.xlu1 %v675_v34, %s3686_s25 }
 0x604   :  { %v432_v35 = vpop.permute.xlu0 %431 }
 0x605   :  { %3206 = vmatmul.mubr.msk.f32.vlgmr.msra.gmra.mxu0 %vm159_vm7, %v432_v35 }
 0x606   :  { %3220 = vmatpush3.msra.mxu0 %v3769_v37  ;;  %3227 = vmatprep.mubr.msk.f32.mxu0 %vm3683_vm0, %v3682_v1 }
 0x607   :  { %3221 = vmatprep.subr.mxu0 %v3682_v1 }
 0x608   :  { %3222 = vmatpush3.msra.mxu0 %v3773_v39 }
 0x609   :  { %3223 = vmatprep.subr.mxu0 %v3682_v1 }
 0x60a   :  { %3224 = vmatpush3.msra.mxu0 %v3781_v41 }
 0x60b   :  { %3225 = vmatprep.subr.mxu0 %v3682_v1 }
 0x60c   :  { %3226 = vmatpush3.msra.mxu0 %v3789_v43 }
 0x60d   :  { %3228 = vmatmul.mubr.msk.f32.vlgmr.msra.gmra.mxu0 %vm159_vm7, %v432_v35  ;;  %3241 = vmatprep.subr.mxu0 %v3682_v1 }
 0x60e   :  { %3242 = vmatpush3.msra.mxu0 %v3850_v22  ;;  %3249 = vmatprep.mubr.msk.f32.mxu0 %vm3683_vm0, %v3682_v1 }
 0x60f   :  { %3243 = vmatprep.subr.mxu0 %v3682_v1 }
 0x610   :  { %v677_v36 = vpop.permute.xlu1 %676  ;;  %3244 = vmatpush3.msra.mxu0 %v3852_v24 }
 0x611   :  { %3239 = vmatmul.mubr.msk.f32.vlgmr.msra.gmra.mxu1 %vm159_vm7, %v677_v36  ;;  %3245 = vmatprep.subr.mxu0 %v3682_v1 }
 0x612   :  { %3253 = vmatpush3.msra.mxu1 %v3723_v4  ;;  %3260 = vmatprep.mubr.msk.f32.mxu1 %vm3683_vm0, %v3682_v1 }
 0x613   :  { %3254 = vmatprep.subr.mxu1 %v3682_v1  ;;  %3246 = vmatpush3.msra.mxu0 %v3856_v26 }
 0x614   :  { %3255 = vmatpush3.msra.mxu1 %v3725_v6  ;;  %3247 = vmatprep.subr.mxu0 %v3682_v1 }
 0x615   :  { %3256 = vmatprep.subr.mxu1 %v3682_v1  ;;  %3248 = vmatpush3.msra.mxu0 %v3860_v27 }
 0x616   :  { %3257 = vmatpush3.msra.mxu1 %v3733_v9  ;;  %3263 = vmatprep.subr.mxu0 %v3682_v1 }
 0x617   :  { %3258 = vmatprep.subr.mxu1 %v3682_v1 }
 0x618   :  { %3259 = vmatpush3.msra.mxu1 %v3736_v10 }
 0x619   :  { %3261 = vmatmul.mubr.msk.f32.vlgmr.msra.gmra.mxu1 %vm159_vm7, %v677_v36  ;;  %3274 = vmatprep.subr.mxu1 %v3682_v1 }
 0x61a   :  { %3275 = vmatpush3.msra.mxu1 %v3771_v38  ;;  %3282 = vmatprep.mubr.msk.f32.mxu1 %vm3683_vm0, %v3682_v1 }
 0x61b   :  { %3276 = vmatprep.subr.mxu1 %v3682_v1 }
 0x61c   :  { %3277 = vmatpush3.msra.mxu1 %v3777_v40 }
 0x61d   :  { %3278 = vmatprep.subr.mxu1 %v3682_v1 }
 0x61e   :  { %3279 = vmatpush3.msra.mxu1 %v3783_v42 }
 0x61f   :  { %3280 = vmatprep.subr.mxu1 %v3682_v1 }
 0x620   :  { %3281 = vmatpush3.msra.mxu1 %v3791_v44 }
 0x621   :  { %3296 = vmatprep.subr.mxu1 %v3682_v1 }
 0x6c5   :  { %v501_v46 = vpop.f32.mrf.mxu0 }
 0x6c6   :  { %v502_v47 = vadd.f32 %v3913_v45, %v501_v46 }
 0x6c7   :  { %v3207_v48 = vpop.f32.mrf.mxu0 }
 0x6c8   :  { %505 = vst [vmem:[%s4380_s2] sm:$0x3] %v502_v47 }
 0x6cd   :  { %v670_v49 = vpop.f32.mrf.mxu0 }
 0x6ce   :  { %v671_v52 = vadd.f32 %v3828_v51, %v670_v49 }
 0x6cf   :  { %v3229_v50 = vpop.f32.mrf.mxu0 }
 0x6d1   :  { %v746_v53 = vpop.f32.mrf.mxu1 }
 0x6d2   :  { %v750_v54 = vadd.f32 %v746_v53, %v671_v52 }
 0x6d3   :  { %v3240_v55 = vpop.f32.mrf.mxu1 }
 0x6d4   :  { %v751_v56 = vmul.f32 %v750_v54, %v3756_v25 }
 0x6d6   :  { %3542 = vtanh.f32 %v751_v56 }
 0x6d9   :  { %v914_v57 = vpop.f32.mrf.mxu1 }
 0x6da   :  { %v919_v58 = vrot.slane %v914_v57, 4 }
 0x6db   :  { %v3262_v59 = vpop.f32.mrf.mxu1 }
 0x6dc   :  { %v921_v60 = vadd.f32 %v919_v58, %v3754_v23 }
 0x6de   :  { %v922_v61 = vmul.f32 %v921_v60, %v3756_v25 }
 0x6e0   :  { %3544 = vtanh.f32 %v922_v61 }
 0x6e3   :  { %v3543_v62 = vpop.eup %3542 }
 0x6e4   :  { %v753_v63 = vmul.f32 %v3543_v62, %v3756_v25 }
 0x6e6   :  { %v754_v0 = vadd.f32 %v753_v63, %v3760_v29 }
 0x6e8   :  { %757 = vrot.lane.b32.xlu0 %v754_v0, %s3685_s0  ;;  %v755_v13 = vmul.f32 %v754_v0, %v3842_v15 }
 0x6ed   :  { %v3545_v2 = vpop.eup %3544 }
 0x6ee   :  { %v924_v3 = vmul.f32 %v3545_v2, %v3756_v25 }
 0x6f0   :  { %v925_v5 = vadd.f32 %v924_v3, %v3760_v29 }
 0x6f2   :  { %931 = vrot.lane.b32.xlu1 %v925_v5, %s3685_s0  ;;  %v929_v18 = vmul.f32 %v927_v17, %v925_v5 }
 0x75a   :  { %v758_v7 = vpop.permute.xlu0 %757 }
 0x75b   :  { %v760_v8 = vmul.f32 %v758_v7, %v754_v0 }
 0x75d   :  { %762 = vrot.lane.b32.xlu0 %v760_v8, %s3686_s25 }
 0x764   :  { %v932_v11 = vpop.permute.xlu1 %931 }
 0x765   :  { %v934_v12 = vmul.f32 %v932_v11, %v925_v5 }
 0x767   :  { %936 = vrot.lane.b32.xlu1 %v934_v12, %s3686_s25 }
 0x7cf   :  { %v763_v14 = vpop.permute.xlu0 %762 }
 0x7d0   :  { %v3932_v16 = vadd.f32 %v763_v14, %v755_v13 }
 0x7d2   :  { %3546 = vtanh.f32 %v3932_v16 }
 0x7d9   :  { %v937_v20 = vpop.permute.xlu1 %936 }
 0x7da   :  { %v3936_v28 = vadd.f32 %v937_v20, %v929_v18 }
 0x7dc   :  { %3548 = vtanh.f32 %v3936_v28  ;;  %v1269_v17 = vrot.slane %v3936_v28, 6 }
 0x7df   :  { %v3547_v30 = vpop.eup %3546 }
 0x7e0   :  { %768 = vrot.lane.b32.xlu0 %v3547_v30, %s3685_s0 }
 0x7e9   :  { %v3549_v31 = vpop.eup %3548 }
 0x7ea   :  { %942 = vrot.lane.b32.xlu1 %v3549_v31, %s3685_s0 }
 0x852   :  { %v769_v15 = vpop.permute.xlu0 %768 }
 0x853   :  { %v771_v32 = vmul.f32 %v769_v15, %v754_v0 }
 0x855   :  { %773 = vrot.lane.b32.xlu0 %v771_v32, %s3686_s25 }
 0x85c   :  { %v943_v33 = vpop.permute.xlu1 %942 }
 0x85d   :  { %v945_v34 = vmul.f32 %v943_v33, %v925_v5 }
 0x85f   :  { %v1017_v35 = vrot.slane %v945_v34, 4 }
 0x861   :  { %1018 = vrot.lane.b32.xlu1 %v1017_v35, %s3686_s25 }
 0x8c7   :  { %v774_v19 = vpop.permute.xlu0 %773 }
 0x8c8   :  { %3250 = vmatmul.mubr.msk.f32.vlgmr.msra.gmra.mxu0 %vm159_vm7, %v774_v19 }
 0x8c9   :  { %3264 = vmatpush3.msra.mxu0 %v3769_v37  ;;  %3271 = vmatprep.mubr.msk.f32.mxu0 %vm3683_vm0, %v3682_v1 }
 0x8ca   :  { %3265 = vmatprep.subr.mxu0 %v3682_v1 }
 0x8cb   :  { %3266 = vmatpush3.msra.mxu0 %v3773_v39 }
 0x8cc   :  { %3267 = vmatprep.subr.mxu0 %v3682_v1 }
 0x8cd   :  { %3268 = vmatpush3.msra.mxu0 %v3781_v41 }
 0x8ce   :  { %3269 = vmatprep.subr.mxu0 %v3682_v1 }
 0x8cf   :  { %3270 = vmatpush3.msra.mxu0 %v3789_v43 }
 0x8d0   :  { %3272 = vmatmul.mubr.msk.f32.vlgmr.msra.gmra.mxu0 %vm159_vm7, %v774_v19  ;;  %3285 = vmatprep.subr.mxu0 %v3682_v1 }
 0x8d1   :  { %3286 = vmatpush3.msra.mxu0 %v3850_v22  ;;  %3293 = vmatprep.mubr.msk.f32.mxu0 %vm3683_vm0, %v3682_v1 }
 0x8d2   :  { %3287 = vmatprep.subr.mxu0 %v3682_v1 }
 0x8d3   :  { %v1019_v36 = vpop.permute.xlu1 %1018  ;;  %3288 = vmatpush3.msra.mxu0 %v3852_v24 }
 0x8d4   :  { %3283 = vmatmul.mubr.msk.f32.vlgmr.msra.gmra.mxu1 %vm159_vm7, %v1019_v36  ;;  %3289 = vmatprep.subr.mxu0 %v3682_v1 }
 0x8d5   :  { %3297 = vmatpush3.msra.mxu1 %v3723_v4  ;;  %3304 = vmatprep.mubr.msk.f32.mxu1 %vm3683_vm0, %v3682_v1 }
 0x8d6   :  { %3298 = vmatprep.subr.mxu1 %v3682_v1  ;;  %3290 = vmatpush3.msra.mxu0 %v3856_v26 }
 0x8d7   :  { %3299 = vmatpush3.msra.mxu1 %v3725_v6  ;;  %3291 = vmatprep.subr.mxu0 %v3682_v1 }
 0x8d8   :  { %3300 = vmatprep.subr.mxu1 %v3682_v1  ;;  %3292 = vmatpush3.msra.mxu0 %v3860_v27 }
 0x8d9   :  { %3301 = vmatpush3.msra.mxu1 %v3733_v9  ;;  %3307 = vmatprep.subr.mxu0 %v3682_v1 }
 0x8da   :  { %3302 = vmatprep.subr.mxu1 %v3682_v1 }
 0x8db   :  { %3303 = vmatpush3.msra.mxu1 %v3736_v10 }
 0x8dc   :  { %3305 = vmatmul.mubr.msk.f32.vlgmr.msra.gmra.mxu1 %vm159_vm7, %v1019_v36  ;;  %3318 = vmatprep.subr.mxu1 %v3682_v1 }
 0x8dd   :  { %3319 = vmatpush3.msra.mxu1 %v3771_v38  ;;  %3326 = vmatprep.mubr.msk.f32.mxu1 %vm3683_vm0, %v3682_v1 }
 0x8de   :  { %3320 = vmatprep.subr.mxu1 %v3682_v1 }
 0x8df   :  { %3321 = vmatpush3.msra.mxu1 %v3777_v40 }
 0x8e0   :  { %3322 = vmatprep.subr.mxu1 %v3682_v1 }
 0x8e1   :  { %3323 = vmatpush3.msra.mxu1 %v3783_v42 }
 0x8e2   :  { %3324 = vmatprep.subr.mxu1 %v3682_v1 }
 0x8e3   :  { %3325 = vmatpush3.msra.mxu1 %v3791_v44 }
 0x8e4   :  { %3340 = vmatprep.subr.mxu1 %v3682_v1 }
 0x988   :  { %v843_v46 = vpop.f32.mrf.mxu0 }
 0x989   :  { %v844_v47 = vadd.f32 %v3913_v45, %v843_v46 }
 0x98a   :  { %v3251_v48 = vpop.f32.mrf.mxu0 }
 0x98b   :  { %847 = vst [vmem:[%s4380_s2 + $0x2] sm:$0x3] %v844_v47 }
 0x990   :  { %v1012_v49 = vpop.f32.mrf.mxu0 }
 0x991   :  { %v1013_v52 = vadd.f32 %v3828_v51, %v1012_v49 }
 0x992   :  { %v3273_v50 = vpop.f32.mrf.mxu0 }
 0x994   :  { %v1088_v53 = vpop.f32.mrf.mxu1 }
 0x995   :  { %v1092_v54 = vadd.f32 %v1088_v53, %v1013_v52 }
 0x996   :  { %v3284_v55 = vpop.f32.mrf.mxu1 }
 0x997   :  { %v1093_v56 = vmul.f32 %v1092_v54, %v3756_v25 }
 0x999   :  { %3550 = vtanh.f32 %v1093_v56 }
 0x99c   :  { %v1256_v57 = vpop.f32.mrf.mxu1 }
 0x99d   :  { %v1261_v58 = vrot.slane %v1256_v57, 2 }
 0x99e   :  { %v3306_v59 = vpop.f32.mrf.mxu1 }
 0x99f   :  { %v1263_v60 = vadd.f32 %v1261_v58, %v3754_v23 }
 0x9a1   :  { %v1264_v61 = vmul.f32 %v1263_v60, %v3756_v25 }
 0x9a3   :  { %3552 = vtanh.f32 %v1264_v61 }
 0x9a6   :  { %v3551_v62 = vpop.eup %3550 }
 0x9a7   :  { %v1095_v63 = vmul.f32 %v3551_v62, %v3756_v25 }
 0x9a9   :  { %v1096_v0 = vadd.f32 %v1095_v63, %v3760_v29 }
 0x9ab   :  { %1099 = vrot.lane.b32.xlu0 %v1096_v0, %s3685_s0  ;;  %v1097_v12 = vmul.f32 %v1096_v0, %v3932_v16 }
 0x9b0   :  { %v3553_v2 = vpop.eup %3552 }
 0x9b1   :  { %v1266_v3 = vmul.f32 %v3553_v2, %v3756_v25 }
 0x9b3   :  { %v1267_v5 = vadd.f32 %v1266_v3, %v3760_v29 }
 0x9b5   :  { %1273 = vrot.lane.b32.xlu1 %v1267_v5, %s3685_s0  ;;  %v1271_v18 = vmul.f32 %v1269_v17, %v1267_v5 }
 0xa1d   :  { %v1100_v7 = vpop.permute.xlu0 %1099 }
 0xa1e   :  { %v1102_v8 = vmul.f32 %v1100_v7, %v1096_v0 }
 0xa20   :  { %1104 = vrot.lane.b32.xlu0 %v1102_v8, %s3686_s25 }
 0xa27   :  { %v1274_v23 = vpop.permute.xlu1 %1273 }
 0xa28   :  { %v1276_v11 = vmul.f32 %v1274_v23, %v1267_v5 }
 0xa2a   :  { %1278 = vrot.lane.b32.xlu1 %v1276_v11, %s3686_s25 }
 0xa92   :  { %v1105_v13 = vpop.permute.xlu0 %1104 }
 0xa93   :  { %v4004_v14 = vadd.f32 %v1105_v13, %v1097_v12 }
 0xa95   :  { %3554 = vtanh.f32 %v4004_v14 }
 0xa9c   :  { %v1279_v20 = vpop.permute.xlu1 %1278 }
 0xa9d   :  { %v4008_v30 = vadd.f32 %v1279_v20, %v1271_v18 }
 0xa9f   :  { %3556 = vtanh.f32 %v4008_v30  ;;  %v1608_v13 = vrot.slane %v4008_v30, 6 }
 0xaa2   :  { %v3555_v31 = vpop.eup %3554 }
 0xaa3   :  { %1110 = vrot.lane.b32.xlu0 %v3555_v31, %s3685_s0 }
 0xaac   :  { %v3557_v15 = vpop.eup %3556 }
 0xaad   :  { %1284 = vrot.lane.b32.xlu1 %v3557_v15, %s3685_s0 }
 0xb15   :  { %v1111_v16 = vpop.permute.xlu0 %1110 }
 0xb16   :  { %v1113_v32 = vmul.f32 %v1111_v16, %v1096_v0 }
 0xb18   :  { %1115 = vrot.lane.b32.xlu0 %v1113_v32, %s3686_s25 }
 0xb1f   :  { %v1285_v33 = vpop.permute.xlu1 %1284 }
 0xb20   :  { %v1287_v34 = vmul.f32 %v1285_v33, %v1267_v5 }
 0xb22   :  { %v1359_v35 = vrot.slane %v1287_v34, 6 }
 0xb24   :  { %1360 = vrot.lane.b32.xlu1 %v1359_v35, %s3686_s25 }
 0xb8a   :  { %v1116_v28 = vpop.permute.xlu0 %1115 }
 0xb8b   :  { %3294 = vmatmul.mubr.msk.f32.vlgmr.msra.gmra.mxu0 %vm159_vm7, %v1116_v28 }
 0xb8c   :  { %3308 = vmatpush3.msra.mxu0 %v3769_v37  ;;  %3315 = vmatprep.mubr.msk.f32.mxu0 %vm3683_vm0, %v3682_v1 }
 0xb8d   :  { %3309 = vmatprep.subr.mxu0 %v3682_v1 }
 0xb8e   :  { %3310 = vmatpush3.msra.mxu0 %v3773_v39 }
 0xb8f   :  { %3311 = vmatprep.subr.mxu0 %v3682_v1 }
 0xb90   :  { %3312 = vmatpush3.msra.mxu0 %v3781_v41 }
 0xb91   :  { %3313 = vmatprep.subr.mxu0 %v3682_v1 }
 0xb92   :  { %3314 = vmatpush3.msra.mxu0 %v3789_v43 }
 0xb93   :  { %3316 = vmatmul.mubr.msk.f32.vlgmr.msra.gmra.mxu0 %vm159_vm7, %v1116_v28  ;;  %3329 = vmatprep.subr.mxu0 %v3682_v1 }
 0xb94   :  { %3330 = vmatpush3.msra.mxu0 %v3850_v22  ;;  %3337 = vmatprep.mubr.msk.f32.mxu0 %vm3683_vm0, %v3682_v1 }
 0xb95   :  { %3331 = vmatprep.subr.mxu0 %v3682_v1 }
 0xb96   :  { %v1361_v19 = vpop.permute.xlu1 %1360  ;;  %3332 = vmatpush3.msra.mxu0 %v3852_v24 }
 0xb97   :  { %3327 = vmatmul.mubr.msk.f32.vlgmr.msra.gmra.mxu1 %vm159_vm7, %v1361_v19  ;;  %3333 = vmatprep.subr.mxu0 %v3682_v1 }
 0xb98   :  { %3341 = vmatpush3.msra.mxu1 %v3723_v4  ;;  %3348 = vmatprep.mubr.msk.f32.mxu1 %vm3683_vm0, %v3682_v1 }
 0xb99   :  { %3342 = vmatprep.subr.mxu1 %v3682_v1  ;;  %3334 = vmatpush3.msra.mxu0 %v3856_v26 }
 0xb9a   :  { %3343 = vmatpush3.msra.mxu1 %v3725_v6  ;;  %3335 = vmatprep.subr.mxu0 %v3682_v1 }
 0xb9b   :  { %3344 = vmatprep.subr.mxu1 %v3682_v1  ;;  %3336 = vmatpush3.msra.mxu0 %v3860_v27 }
 0xb9c   :  { %3345 = vmatpush3.msra.mxu1 %v3733_v9  ;;  %3351 = vmatprep.subr.mxu0 %v3682_v1 }
 0xb9d   :  { %3346 = vmatprep.subr.mxu1 %v3682_v1 }
 0xb9e   :  { %3347 = vmatpush3.msra.mxu1 %v3736_v10 }
 0xb9f   :  { %3349 = vmatmul.mubr.msk.f32.vlgmr.msra.gmra.mxu1 %vm159_vm7, %v1361_v19  ;;  %3362 = vmatprep.subr.mxu1 %v3682_v1 }
 0xba0   :  { %3363 = vmatpush3.msra.mxu1 %v3771_v38  ;;  %3370 = vmatprep.mubr.msk.f32.mxu1 %vm3683_vm0, %v3682_v1 }
 0xba1   :  { %3364 = vmatprep.subr.mxu1 %v3682_v1 }
 0xba2   :  { %3365 = vmatpush3.msra.mxu1 %v3777_v40 }
 0xba3   :  { %3366 = vmatprep.subr.mxu1 %v3682_v1 }
 0xba4   :  { %3367 = vmatpush3.msra.mxu1 %v3783_v42 }
 0xba5   :  { %3368 = vmatprep.subr.mxu1 %v3682_v1 }
 0xba6   :  { %3369 = vmatpush3.msra.mxu1 %v3791_v44 }
 0xba7   :  { %3384 = vmatprep.subr.mxu1 %v3682_v1 }
 0xc4b   :  { %v1185_v36 = vpop.f32.mrf.mxu0 }
 0xc4c   :  { %v1186_v46 = vadd.f32 %v3913_v45, %v1185_v36 }
 0xc4d   :  { %v3295_v47 = vpop.f32.mrf.mxu0 }
 0xc4e   :  { %1189 = vst [vmem:[%s4380_s2 + $0x4] sm:$0x3] %v1186_v46 }
 0xc53   :  { %v1354_v48 = vpop.f32.mrf.mxu0 }
 0xc54   :  { %v1355_v50 = vadd.f32 %v3828_v51, %v1354_v48 }
 0xc55   :  { %v3317_v49 = vpop.f32.mrf.mxu0 }
 0xc57   :  { %v1430_v52 = vpop.f32.mrf.mxu1 }
 0xc58   :  { %v1434_v53 = vadd.f32 %v1430_v52, %v1355_v50 }
 0xc59   :  { %v3328_v54 = vpop.f32.mrf.mxu1 }
 0xc5a   :  { %v1435_v55 = vmul.f32 %v1434_v53, %v3756_v25 }
 0xc5c   :  { %3558 = vtanh.f32 %v1435_v55 }
 0xc5f   :  { %v1598_v56 = vpop.f32.mrf.mxu1 }
 0xc60   :  { %v1602_v57 = vadd.f32 %v1598_v56, %v3752_v21 }
 0xc61   :  { %v3350_v58 = vpop.f32.mrf.mxu1 }
 0xc62   :  { %v1603_v59 = vmul.f32 %v1602_v57, %v3756_v25 }
 0xc64   :  { %3560 = vtanh.f32 %v1603_v59 }
 0xc69   :  { %v3559_v60 = vpop.eup %3558 }
 0xc6a   :  { %v1437_v61 = vmul.f32 %v3559_v60, %v3756_v25 }
 0xc6c   :  { %v1438_v62 = vadd.f32 %v1437_v61, %v3760_v29 }
 0xc6e   :  { %1441 = vrot.lane.b32.xlu0 %v1438_v62, %s3685_s0  ;;  %v1439_v23 = vmul.f32 %v1438_v62, %v4004_v14 }
 0xc71   :  { %v3561_v63 = vpop.eup %3560 }
 0xc72   :  { %v1605_v0 = vmul.f32 %v3561_v63, %v3756_v25 }
 0xc74   :  { %v1606_v2 = vadd.f32 %v1605_v0, %v3760_v29 }
 0xc76   :  { %1612 = vrot.lane.b32.xlu1 %v1606_v2, %s3685_s0  ;;  %v1610_v17 = vmul.f32 %v1608_v13, %v1606_v2 }
 0xce0   :  { %v1442_v3 = vpop.permute.xlu0 %1441 }
 0xce1   :  { %v1444_v5 = vmul.f32 %v1442_v3, %v1438_v62 }
 0xce3   :  { %1446 = vrot.lane.b32.xlu0 %v1444_v5, %s3686_s25 }
 0xce8   :  { %v1613_v7 = vpop.permute.xlu1 %1612 }
 0xce9   :  { %v1615_v8 = vmul.f32 %v1613_v7, %v1606_v2 }
 0xceb   :  { %1617 = vrot.lane.b32.xlu1 %v1615_v8, %s3686_s25 }
 0xd55   :  { %v1447_v11 = vpop.permute.xlu0 %1446 }
 0xd56   :  { %v4076_v12 = vadd.f32 %v1447_v11, %v1439_v23 }
 0xd58   :  { %3562 = vtanh.f32 %v4076_v12 }
 0xd5d   :  { %v1618_v18 = vpop.permute.xlu1 %1617 }
 0xd5e   :  { %v4080_v20 = vadd.f32 %v1618_v18, %v1610_v17  ;;  %v4195_v18 = vld [vmem:[#allocation2 + $0x18] sm:$0xff] }
 0xd60   :  { %3564 = vtanh.f32 %v4080_v20  ;;  %v1949_v63 = vrot.slane %v4080_v20, 6  ;;  %v4201_v20 = vld [vmem:[#allocation2 + $0x50] sm:$0xff] }
 0xd65   :  { %v3563_v31 = vpop.eup %3562 }
 0xd66   :  { %1452 = vrot.lane.b32.xlu0 %v3563_v31, %s3685_s0  ;;  %v4207_v31 = vld [vmem:[#allocation2 + $0x48] sm:$0xff] }
 0xd6d   :  { %v3565_v15 = vpop.eup %3564 }
 0xd6e   :  { %1623 = vrot.lane.b32.xlu1 %v3565_v15, %s3685_s0  ;;  %v4211_v15 = vld [vmem:[#allocation2 + $0x40] sm:$0xff] }
 0xdd8   :  { %v1453_v14 = vpop.permute.xlu0 %1452 }
 0xdd9   :  { %v1455_v16 = vmul.f32 %v1453_v14, %v1438_v62  ;;  %v4215_v14 = vld [vmem:[#allocation2 + $0x38] sm:$0xff] }
 0xddb   :  { %1457 = vrot.lane.b32.xlu0 %v1455_v16, %s3686_s25 }
 0xde0   :  { %v1624_v32 = vpop.permute.xlu1 %1623 }
 0xde1   :  { %v1626_v33 = vmul.f32 %v1624_v32, %v1606_v2 }
 0xde3   :  { %1698 = vrot.lane.b32.xlu1 %v1626_v33, %s3686_s25 }
 0xe4d   :  { %v1458_v30 = vpop.permute.xlu0 %1457 }
 0xe4e   :  { %3338 = vmatmul.mubr.msk.f32.vlgmr.msra.gmra.mxu0 %vm159_vm7, %v1458_v30 }
 0xe4f   :  { %3352 = vmatpush3.msra.mxu0 %v3769_v37  ;;  %3359 = vmatprep.mubr.msk.f32.mxu0 %vm3683_vm0, %v3682_v1 }
 0xe50   :  { %3353 = vmatprep.subr.mxu0 %v3682_v1 }
 0xe51   :  { %3354 = vmatpush3.msra.mxu0 %v3773_v39 }
 0xe52   :  { %3355 = vmatprep.subr.mxu0 %v3682_v1 }
 0xe53   :  { %3356 = vmatpush3.msra.mxu0 %v3781_v41 }
 0xe54   :  { %3357 = vmatprep.subr.mxu0 %v3682_v1 }
 0xe55   :  { %3358 = vmatpush3.msra.mxu0 %v3789_v43  ;;  %v1699_v34 = vpop.permute.xlu1 %1698 }
 0xe56   :  { %3360 = vmatmul.mubr.msk.f32.vlgmr.msra.gmra.mxu0 %vm159_vm7, %v1458_v30  ;;  %3371 = vmatmul.mubr.msk.f32.vlgmr.msra.gmra.mxu1 %vm159_vm7, %v1699_v34 }
 0xe57   :  { %3385 = vmatpush3.msra.mxu1 %v3723_v4  ;;  %3392 = vmatprep.mubr.msk.f32.mxu1 %vm3683_vm0, %v3682_v1 }
 0xe58   :  { %3386 = vmatprep.subr.mxu1 %v3682_v1  ;;  %3373 = vmatprep.subr.mxu0 %v3682_v1 }
 0xe59   :  { %3387 = vmatpush3.msra.mxu1 %v3725_v6  ;;  %3374 = vmatpush3.msra.mxu0 %v3850_v22 }
 0xe5a   :  { %3388 = vmatprep.subr.mxu1 %v3682_v1  ;;  %3375 = vmatprep.subr.mxu0 %v3682_v1 }
 0xe5b   :  { %3389 = vmatpush3.msra.mxu1 %v3733_v9  ;;  %3376 = vmatpush3.msra.mxu0 %v3852_v24 }
 0xe5c   :  { %3390 = vmatprep.subr.mxu1 %v3682_v1  ;;  %3377 = vmatprep.subr.mxu0 %v3682_v1 }
 0xe5d   :  { %3391 = vmatpush3.msra.mxu1 %v3736_v10  ;;  %3378 = vmatpush3.msra.mxu0 %v3856_v26 }
 0xe5e   :  { %3393 = vmatmul.mubr.msk.f32.vlgmr.msra.gmra.mxu1 %vm159_vm7, %v1699_v34  ;;  %3379 = vmatprep.subr.mxu0 %v3682_v1 }
 0xe5f   :  { %3380 = vmatpush3.msra.mxu0 %v3860_v27  ;;  %3381 = vmatprep.mubr.msk.f32.mxu0 %vm3683_vm0, %v3682_v1 }
 0xe60   :  { %3395 = vmatprep.subr.mxu0 %v3682_v1  ;;  %3406 = vmatprep.subr.mxu1 %v3682_v1 }
 0xe61   :  { %3407 = vmatpush3.msra.mxu1 %v3771_v38  ;;  %3414 = vmatprep.mubr.msk.f32.mxu1 %vm3683_vm0, %v3682_v1 }
 0xe62   :  { %3408 = vmatprep.subr.mxu1 %v3682_v1 }
 0xe63   :  { %3409 = vmatpush3.msra.mxu1 %v3777_v40 }
 0xe64   :  { %3410 = vmatprep.subr.mxu1 %v3682_v1 }
 0xe65   :  { %3411 = vmatpush3.msra.mxu1 %v3783_v42 }
 0xe66   :  { %3412 = vmatprep.subr.mxu1 %v3682_v1 }
 0xe67   :  { %3413 = vmatpush3.msra.mxu1 %v3791_v44 }
 0xe68   :  { %3428 = vmatprep.subr.mxu1 %v3682_v1 }
 0xf0e   :  { %v1527_v4 = vpop.f32.mrf.mxu0 }
 0xf0f   :  { %v1528_v6 = vadd.f32 %v3913_v45, %v1527_v4 }
 0xf10   :  { %v3339_v9 = vpop.f32.mrf.mxu0 }
 0xf11   :  { %1531 = vst [vmem:[%s4380_s2 + $0x6] sm:$0x3] %v1528_v6 }
 0xf16   :  { %v1693_v10 = vpop.f32.mrf.mxu0  ;;  %v1768_v38 = vpop.f32.mrf.mxu1 }
 0xf17   :  { %v1694_v40 = vadd.f32 %v3828_v51, %v1693_v10 }
 0xf18   :  { %v3361_v35 = vpop.f32.mrf.mxu0  ;;  %v3372_v42 = vpop.f32.mrf.mxu1 }
 0xf19   :  { %v1772_v28 = vadd.f32 %v1768_v38, %v1694_v40 }
 0xf1b   :  { %v1773_v19 = vmul.f32 %v1772_v28, %v3756_v25 }
 0xf1d   :  { %3566 = vtanh.f32 %v1773_v19 }
 0xf1e   :  { %v1936_v44 = vpop.f32.mrf.mxu1 }
 0xf1f   :  { %v1941_v36 = vrot.slane %v1936_v44, 6 }
 0xf20   :  { %v3394_v46 = vpop.f32.mrf.mxu1 }
 0xf21   :  { %v1943_v47 = vadd.f32 %v1941_v36, %v3752_v21 }
 0xf23   :  { %v1944_v48 = vmul.f32 %v1943_v47, %v3756_v25 }
 0xf25   :  { %3568 = vtanh.f32 %v1944_v48 }
 0xf2a   :  { %v3567_v49 = vpop.eup %3566 }
 0xf2b   :  { %v1775_v50 = vmul.f32 %v3567_v49, %v3756_v25 }
 0xf2d   :  { %v1776_v52 = vadd.f32 %v1775_v50, %v3760_v29 }
 0xf2f   :  { %1779 = vrot.lane.b32.xlu0 %v1776_v52, %s3685_s0  ;;  %v1777_v60 = vmul.f32 %v1776_v52, %v4076_v12 }
 0xf32   :  { %v3569_v53 = vpop.eup %3568 }
 0xf33   :  { %v1946_v54 = vmul.f32 %v3569_v53, %v3756_v25 }
 0xf35   :  { %v1947_v55 = vadd.f32 %v1946_v54, %v3760_v29 }
 0xf37   :  { %1953 = vrot.lane.b32.xlu1 %v1947_v55, %s3685_s0  ;;  %v1951_v0 = vmul.f32 %v1949_v63, %v1947_v55 }
 0xfa1   :  { %v1780_v56 = vpop.permute.xlu0 %1779 }
 0xfa2   :  { %v1782_v57 = vmul.f32 %v1780_v56, %v1776_v52 }
 0xfa4   :  { %1784 = vrot.lane.b32.xlu0 %v1782_v57, %s3686_s25 }
 0xfa9   :  { %v1954_v58 = vpop.permute.xlu1 %1953 }
 0xfaa   :  { %v1956_v59 = vmul.f32 %v1954_v58, %v1947_v55 }
 0xfac   :  { %1958 = vrot.lane.b32.xlu1 %v1956_v59, %s3686_s25 }
0x1016   :  { %v1785_v61 = vpop.permute.xlu0 %1784 }
0x1017   :  { %v4148_v62 = vadd.f32 %v1785_v61, %v1777_v60 }
0x1019   :  { %3570 = vtanh.f32 %v4148_v62 }
0x101e   :  { %v1959_v2 = vpop.permute.xlu1 %1958 }
0x101f   :  { %v4152_v3 = vadd.f32 %v1959_v2, %v1951_v0 }
0x1021   :  { %3572 = vtanh.f32 %v4152_v3  ;;  %v2291_v57 = vrot.slane %v4152_v3, 6 }
0x1026   :  { %v3571_v5 = vpop.eup %3570 }
0x1027   :  { %1790 = vrot.lane.b32.xlu0 %v3571_v5, %s3685_s0 }
0x102e   :  { %v3573_v7 = vpop.eup %3572 }
0x102f   :  { %1964 = vrot.lane.b32.xlu1 %v3573_v7, %s3685_s0 }
0x1099   :  { %v1791_v8 = vpop.permute.xlu0 %1790 }
0x109a   :  { %v1793_v23 = vmul.f32 %v1791_v8, %v1776_v52  ;;  %v4248_v8 = vld [vmem:[#allocation2 + $0x70] sm:$0xff] }
0x109c   :  { %1795 = vrot.lane.b32.xlu0 %v1793_v23, %s3686_s25  ;;  %v4254_v23 = vld [vmem:[#allocation2 + $0x68] sm:$0xff] }
0x10a1   :  { %v1965_v11 = vpop.permute.xlu1 %1964 }
0x10a2   :  { %v1967_v12 = vmul.f32 %v1965_v11, %v1947_v55  ;;  %v4258_v11 = vld [vmem:[#allocation2 + $0x60] sm:$0xff] }
0x10a4   :  { %v2039_v13 = vrot.slane %v1967_v12, 2  ;;  %v4262_v12 = vld [vmem:[#allocation2 + $0x58] sm:$0xff] }
0x10a6   :  { %2040 = vrot.lane.b32.xlu1 %v2039_v13, %s3686_s25 }
0x110e   :  { %v1796_v17 = vpop.permute.xlu0 %1795 }
0x110f   :  { %3382 = vmatmul.mubr.msk.f32.vlgmr.msra.gmra.mxu0 %vm159_vm7, %v1796_v17 }
0x1110   :  { %3396 = vmatpush3.msra.mxu0 %v3769_v37  ;;  %3403 = vmatprep.mubr.msk.f32.mxu0 %vm3683_vm0, %v3682_v1 }
0x1111   :  { %3397 = vmatprep.subr.mxu0 %v3682_v1 }
0x1112   :  { %3398 = vmatpush3.msra.mxu0 %v3773_v39  ;;  %v4176_v39 = vld [vmem:[#allocation2 + $0x30] sm:$0xff] }
0x1113   :  { %3399 = vmatprep.subr.mxu0 %v3682_v1 }
0x1114   :  { %3400 = vmatpush3.msra.mxu0 %v3781_v41  ;;  %v4183_v41 = vld [vmem:[#allocation2 + $0x28] sm:$0xff] }
0x1115   :  { %3401 = vmatprep.subr.mxu0 %v3682_v1 }
0x1116   :  { %3402 = vmatpush3.msra.mxu0 %v3789_v43  ;;  %v4189_v43 = vld [vmem:[#allocation2 + $0x20] sm:$0xff] }
0x1117   :  { %3404 = vmatmul.mubr.msk.f32.vlgmr.msra.gmra.mxu0 %vm159_vm7, %v1796_v17  ;;  %3417 = vmatprep.subr.mxu0 %v3682_v1 }
0x1118   :  { %v2041_v37 = vpop.permute.xlu1 %2040  ;;  %3418 = vmatpush3.msra.mxu0 %v3850_v22  ;;  %3425 = vmatprep.mubr.msk.f32.mxu0 %vm3683_vm0, %v3682_v1 }
0x1119   :  { %3415 = vmatmul.mubr.msk.f32.vlgmr.msra.gmra.mxu1 %vm159_vm7, %v2041_v37  ;;  %3419 = vmatprep.subr.mxu0 %v3682_v1 }
0x111a   :  { %3429 = vmatpush3.msra.mxu1 %v4176_v39  ;;  %3436 = vmatprep.mubr.msk.f32.mxu1 %vm3683_vm0, %v3682_v1 }
0x111b   :  { %3430 = vmatprep.subr.mxu1 %v3682_v1  ;;  %3420 = vmatpush3.msra.mxu0 %v3852_v24 }
0x111c   :  { %3431 = vmatpush3.msra.mxu1 %v4183_v41  ;;  %3421 = vmatprep.subr.mxu0 %v3682_v1 }
0x111d   :  { %3432 = vmatprep.subr.mxu1 %v3682_v1  ;;  %3422 = vmatpush3.msra.mxu0 %v3856_v26 }
0x111e   :  { %3433 = vmatpush3.msra.mxu1 %v4189_v43  ;;  %3423 = vmatprep.subr.mxu0 %v3682_v1 }
0x111f   :  { %3434 = vmatprep.subr.mxu1 %v3682_v1  ;;  %3424 = vmatpush3.msra.mxu0 %v3860_v27 }
0x1120   :  { %3435 = vmatpush3.msra.mxu1 %v4195_v18  ;;  %3439 = vmatprep.subr.mxu0 %v3682_v1 }
0x1121   :  { %3437 = vmatmul.mubr.msk.f32.vlgmr.msra.gmra.mxu1 %vm159_vm7, %v2041_v37  ;;  %3450 = vmatprep.subr.mxu1 %v3682_v1  ;;  %v4302_v37 = vld [vmem:[#allocation2 + $0x99] ss:$0 sm:$0xff] }
0x1122   :  { %3451 = vmatpush3.msra.mxu1 %v4201_v20  ;;  %3458 = vmatprep.mubr.msk.f32.mxu1 %vm3683_vm0, %v3682_v1 }
0x1123   :  { %3452 = vmatprep.subr.mxu1 %v3682_v1 }
0x1124   :  { %3453 = vmatpush3.msra.mxu1 %v4207_v31 }
0x1125   :  { %3454 = vmatprep.subr.mxu1 %v3682_v1 }
0x1126   :  { %3455 = vmatpush3.msra.mxu1 %v4211_v15 }
0x1127   :  { %3456 = vmatprep.subr.mxu1 %v3682_v1 }
0x1128   :  { %3457 = vmatpush3.msra.mxu1 %v4215_v14 }
0x1129   :  { %3472 = vmatprep.subr.mxu1 %v3682_v1 }
0x11cf   :  { %v1865_v16 = vpop.f32.mrf.mxu0 }
0x11d0   :  { %v1866_v32 = vadd.f32 %v3913_v45, %v1865_v16 }
0x11d1   :  { %v3383_v33 = vpop.f32.mrf.mxu0 }
0x11d2   :  { %1869 = vst [vmem:[%s4380_s2 + $0x8] sm:$0x3] %v1866_v32 }
0x11d7   :  { %v2034_v30 = vpop.f32.mrf.mxu0 }
0x11d8   :  { %v2035_v34 = vadd.f32 %v3828_v51, %v2034_v30 }
0x11d9   :  { %v3405_v4 = vpop.f32.mrf.mxu0  ;;  %v2110_v6 = vpop.f32.mrf.mxu1 }
0x11da   :  { %v2114_v9 = vadd.f32 %v2110_v6, %v2035_v34 }
0x11db   :  { %v3416_v10 = vpop.f32.mrf.mxu1 }
0x11dc   :  { %v2115_v38 = vmul.f32 %v2114_v9, %v3756_v25 }
0x11de   :  { %3574 = vtanh.f32 %v2115_v38 }
0x11e1   :  { %v2278_v40 = vpop.f32.mrf.mxu1 }
0x11e2   :  { %v2283_v35 = vrot.slane %v2278_v40, 4 }
0x11e3   :  { %v3438_v42 = vpop.f32.mrf.mxu1 }
0x11e4   :  { %v2285_v28 = vadd.f32 %v2283_v35, %v3752_v21 }
0x11e6   :  { %v2286_v19 = vmul.f32 %v2285_v28, %v3756_v25 }
0x11e8   :  { %3576 = vtanh.f32 %v2286_v19 }
0x11eb   :  { %v3575_v44 = vpop.eup %3574 }
0x11ec   :  { %v2117_v36 = vmul.f32 %v3575_v44, %v3756_v25 }
0x11ee   :  { %v2118_v51 = vadd.f32 %v2117_v36, %v3760_v29 }
0x11f0   :  { %2121 = vrot.lane.b32.xlu0 %v2118_v51, %s3685_s0  ;;  %v2119_v54 = vmul.f32 %v2118_v51, %v4148_v62 }
0x11f5   :  { %v3577_v46 = vpop.eup %3576 }
0x11f6   :  { %v2288_v47 = vmul.f32 %v3577_v46, %v3756_v25 }
0x11f8   :  { %v2289_v48 = vadd.f32 %v2288_v47, %v3760_v29 }
0x11fa   :  { %2295 = vrot.lane.b32.xlu1 %v2289_v48, %s3685_s0  ;;  %v2293_v58 = vmul.f32 %v2291_v57, %v2289_v48  ;;  %v3609_v57 = vld [vmem:[#allocation2 + $0x80] sm:$0xff] }
0x1262   :  { %v2122_v49 = vpop.permute.xlu0 %2121 }
0x1263   :  { %v2124_v50 = vmul.f32 %v2122_v49, %v2118_v51 }
0x1265   :  { %2126 = vrot.lane.b32.xlu0 %v2124_v50, %s3686_s25 }
0x126c   :  { %v2296_v52 = vpop.permute.xlu1 %2295 }
0x126d   :  { %v2298_v53 = vmul.f32 %v2296_v52, %v2289_v48 }
0x126f   :  { %2300 = vrot.lane.b32.xlu1 %v2298_v53, %s3686_s25 }
0x12d7   :  { %v2127_v55 = vpop.permute.xlu0 %2126 }
0x12d8   :  { %v4236_v56 = vadd.f32 %v2127_v55, %v2119_v54  ;;  %v3607_v54 = vld [vmem:[#allocation2 + $0x90] sm:$0xff] }
0x12da   :  { %3578 = vtanh.f32 %v4236_v56 }
0x12e1   :  { %v2301_v59 = vpop.permute.xlu1 %2300 }
0x12e2   :  { %v4240_v60 = vadd.f32 %v2301_v59, %v2293_v58  ;;  %v3610_v58 = vld [vmem:[#allocation2 + $0x78] sm:$0xff] }
0x12e4   :  { %3580 = vtanh.f32 %v4240_v60  ;;  %v2633_v28 = vrot.slane %v4240_v60, 6  ;;  %v4346_v60 = vld [vmem:[#allocation2 + $0x9a] ss:$0 sm:$0xff] }
0x12e7   :  { %v3579_v61 = vpop.eup %3578 }
0x12e8   :  { %2132 = vrot.lane.b32.xlu0 %v3579_v61, %s3685_s0 }
0x12f1   :  { %v3581_v63 = vpop.eup %3580 }
0x12f2   :  { %2306 = vrot.lane.b32.xlu1 %v3581_v63, %s3685_s0 }
0x135a   :  { %v2133_v62 = vpop.permute.xlu0 %2132 }
0x135b   :  { %v2135_v0 = vmul.f32 %v2133_v62, %v2118_v51 }
0x135d   :  { %2137 = vrot.lane.b32.xlu0 %v2135_v0, %s3686_s25 }
0x1364   :  { %v2307_v2 = vpop.permute.xlu1 %2306 }
0x1365   :  { %v2309_v5 = vmul.f32 %v2307_v2, %v2289_v48 }
0x1367   :  { %v2381_v7 = vrot.slane %v2309_v5, 4 }
0x1369   :  { %2382 = vrot.lane.b32.xlu1 %v2381_v7, %s3686_s25 }
0x13cf   :  { %v2138_v3 = vpop.permute.xlu0 %2137 }
0x13d0   :  { %3426 = vmatmul.mubr.msk.f32.vlgmr.msra.gmra.mxu0 %vm159_vm7, %v2138_v3 }
0x13d1   :  { %3440 = vmatpush3.msra.mxu0 %v4248_v8  ;;  %3447 = vmatprep.mubr.msk.f32.mxu0 %vm3683_vm0, %v3682_v1 }
0x13d2   :  { %3441 = vmatprep.subr.mxu0 %v3682_v1 }
0x13d3   :  { %3442 = vmatpush3.msra.mxu0 %v4254_v23 }
0x13d4   :  { %3443 = vmatprep.subr.mxu0 %v3682_v1 }
0x13d5   :  { %3444 = vmatpush3.msra.mxu0 %v4258_v11 }
0x13d6   :  { %3445 = vmatprep.subr.mxu0 %v3682_v1 }
0x13d7   :  { %3446 = vmatpush3.msra.mxu0 %v4262_v12 }
0x13d8   :  { %3448 = vmatmul.mubr.msk.f32.vlgmr.msra.gmra.mxu0 %vm159_vm7, %v2138_v3  ;;  %3461 = vmatprep.subr.mxu0 %v3682_v1 }
0x13d9   :  { %3462 = vmatpush3.msra.mxu0 %v3850_v22  ;;  %3469 = vmatprep.mubr.msk.f32.mxu0 %vm3683_vm0, %v3682_v1 }
0x13da   :  { %3463 = vmatprep.subr.mxu0 %v3682_v1 }
0x13db   :  { %v2383_v13 = vpop.permute.xlu1 %2382  ;;  %3464 = vmatpush3.msra.mxu0 %v3852_v24 }
0x13dc   :  { %3459 = vmatmul.mubr.msk.f32.vlgmr.msra.gmra.mxu1 %vm159_vm7, %v2383_v13  ;;  %3465 = vmatprep.subr.mxu0 %v3682_v1 }
0x13dd   :  { %3473 = vmatpush3.msra.mxu1 %v4176_v39  ;;  %3480 = vmatprep.mubr.msk.f32.mxu1 %vm3683_vm0, %v3682_v1 }
0x13de   :  { %3474 = vmatprep.subr.mxu1 %v3682_v1  ;;  %3466 = vmatpush3.msra.mxu0 %v3856_v26 }
0x13df   :  { %3475 = vmatpush3.msra.mxu1 %v4183_v41  ;;  %3467 = vmatprep.subr.mxu0 %v3682_v1 }
0x13e0   :  { %3476 = vmatprep.subr.mxu1 %v3682_v1  ;;  %3468 = vmatpush3.msra.mxu0 %v3860_v27 }
0x13e1   :  { %3477 = vmatpush3.msra.mxu1 %v4189_v43  ;;  %3483 = vmatprep.subr.mxu0 %v3682_v1 }
0x13e2   :  { %3478 = vmatprep.subr.mxu1 %v3682_v1 }
0x13e3   :  { %3479 = vmatpush3.msra.mxu1 %v4195_v18 }
0x13e4   :  { %3481 = vmatmul.mubr.msk.f32.vlgmr.msra.gmra.mxu1 %vm159_vm7, %v2383_v13  ;;  %3494 = vmatprep.subr.mxu1 %v3682_v1 }
0x13e5   :  { %3495 = vmatpush3.msra.mxu1 %v4201_v20  ;;  %3502 = vmatprep.mubr.msk.f32.mxu1 %vm3683_vm0, %v3682_v1 }
0x13e6   :  { %3496 = vmatprep.subr.mxu1 %v3682_v1 }
0x13e7   :  { %3497 = vmatpush3.msra.mxu1 %v4207_v31 }
0x13e8   :  { %3498 = vmatprep.subr.mxu1 %v3682_v1 }
0x13e9   :  { %3499 = vmatpush3.msra.mxu1 %v4211_v15 }
0x13ea   :  { %3500 = vmatprep.subr.mxu1 %v3682_v1 }
0x13eb   :  { %3501 = vmatpush3.msra.mxu1 %v4215_v14 }
0x1490   :  { %v2207_v22 = vpop.f32.mrf.mxu0 }
0x1491   :  { %v2208_v24 = vadd.f32 %v3913_v45, %v2207_v22 }
0x1492   :  { %v3427_v26 = vpop.f32.mrf.mxu0 }
0x1493   :  { %2211 = vst [vmem:[%s4380_s2 + $0xa] sm:$0x3] %v2208_v24 }
0x1498   :  { %v2376_v27 = vpop.f32.mrf.mxu0 }
0x1499   :  { %v2377_v39 = vadd.f32 %v4302_v37, %v2376_v27 }
0x149a   :  { %v3449_v17 = vpop.f32.mrf.mxu0 }
0x149c   :  { %v2452_v41 = vpop.f32.mrf.mxu1 }
0x149d   :  { %v2456_v43 = vadd.f32 %v2452_v41, %v2377_v39 }
0x149e   :  { %v3460_v18 = vpop.f32.mrf.mxu1 }
0x149f   :  { %v2457_v20 = vmul.f32 %v2456_v43, %v3756_v25 }
0x14a1   :  { %3582 = vtanh.f32 %v2457_v20 }
0x14a4   :  { %v2620_v31 = vpop.f32.mrf.mxu1 }
0x14a5   :  { %v2625_v15 = vrot.slane %v2620_v31, 2 }
0x14a6   :  { %v3482_v45 = vpop.f32.mrf.mxu1 }
0x14a7   :  { %v2627_v14 = vadd.f32 %v2625_v15, %v3752_v21 }
0x14a9   :  { %v2628_v16 = vmul.f32 %v2627_v14, %v3756_v25 }
0x14ab   :  { %3584 = vtanh.f32 %v2628_v16 }
0x14ae   :  { %v3583_v32 = vpop.eup %3582 }
0x14af   :  { %v2459_v33 = vmul.f32 %v3583_v32, %v3756_v25 }
0x14b1   :  { %v2460_v30 = vadd.f32 %v2459_v33, %v3760_v29 }
0x14b3   :  { %2463 = vrot.lane.b32.xlu0 %v2460_v30, %s3685_s0  ;;  %v2461_v40 = vmul.f32 %v2460_v30, %v4236_v56  ;;  %v3608_v56 = vld [vmem:[#allocation2 + $0x88] sm:$0xff] }
0x14b8   :  { %v3585_v34 = vpop.eup %3584 }
0x14b9   :  { %v2630_v4 = vmul.f32 %v3585_v34, %v3756_v25 }
0x14bb   :  { %v2631_v6 = vadd.f32 %v2630_v4, %v3760_v29 }
0x14bd   :  { %2637 = vrot.lane.b32.xlu1 %v2631_v6, %s3685_s0  ;;  %v2635_v19 = vmul.f32 %v2633_v28, %v2631_v6 }
0x1525   :  { %v2464_v9 = vpop.permute.xlu0 %2463 }
0x1526   :  { %v2466_v10 = vmul.f32 %v2464_v9, %v2460_v30 }
0x1528   :  { %2468 = vrot.lane.b32.xlu0 %v2466_v10, %s3686_s25 }
0x152f   :  { %v2638_v21 = vpop.permute.xlu1 %2637 }
0x1530   :  { %v2640_v38 = vmul.f32 %v2638_v21, %v2631_v6 }
0x1532   :  { %2642 = vrot.lane.b32.xlu1 %v2640_v38, %s3686_s25 }
0x159a   :  { %v2469_v35 = vpop.permute.xlu0 %2468 }
0x159b   :  { %v4317_v42 = vadd.f32 %v2469_v35, %v2461_v40 }
0x159d   :  { %3586 = vtanh.f32 %v4317_v42 }
0x15a4   :  { %v2643_v44 = vpop.permute.xlu1 %2642 }
0x15a5   :  { %v4321_v36 = vadd.f32 %v2643_v44, %v2635_v19 }
0x15a7   :  { %3588 = vtanh.f32 %v4321_v36 }
0x15aa   :  { %v3587_v51 = vpop.eup %3586 }
0x15ab   :  { %2474 = vrot.lane.b32.xlu0 %v3587_v51, %s3685_s0 }
0x15b4   :  { %v3589_v46 = vpop.eup %3588 }
0x15b5   :  { %2648 = vrot.lane.b32.xlu1 %v3589_v46, %s3685_s0 }
0x161d   :  { %v2475_v47 = vpop.permute.xlu0 %2474 }
0x161e   :  { %v2477_v48 = vmul.f32 %v2475_v47, %v2460_v30 }
0x1620   :  { %2479 = vrot.lane.b32.xlu0 %v2477_v48, %s3686_s25 }
0x1627   :  { %v2649_v49 = vpop.permute.xlu1 %2648 }
0x1628   :  { %v2651_v50 = vmul.f32 %v2649_v49, %v2631_v6 }
0x162a   :  { %v2723_v52 = vrot.slane %v2651_v50, 6 }
0x162c   :  { %2724 = vrot.lane.b32.xlu1 %v2723_v52, %s3686_s25 }
0x1692   :  { %v2480_v53 = vpop.permute.xlu0 %2479 }
0x1693   :  { %3470 = vmatmul.mubr.msk.f32.vlgmr.msra.gmra.mxu0 %vm159_vm7, %v2480_v53 }
0x1694   :  { %3484 = vmatpush3.msra.mxu0 %v4248_v8  ;;  %3491 = vmatprep.mubr.msk.f32.mxu0 %vm3683_vm0, %v3682_v1 }
0x1695   :  { %3485 = vmatprep.subr.mxu0 %v3682_v1 }
0x1696   :  { %3486 = vmatpush3.msra.mxu0 %v4254_v23 }
0x1697   :  { %3487 = vmatprep.subr.mxu0 %v3682_v1 }
0x1698   :  { %3488 = vmatpush3.msra.mxu0 %v4258_v11 }
0x1699   :  { %3489 = vmatprep.subr.mxu0 %v3682_v1 }
0x169a   :  { %3490 = vmatpush3.msra.mxu0 %v4262_v12 }
0x169b   :  { %3492 = vmatmul.mubr.msk.f32.vlgmr.msra.gmra.mxu0 %vm159_vm7, %v2480_v53  ;;  %3505 = vmatprep.subr.mxu0 %v3682_v1 }
0x169c   :  { %3506 = vmatpush3.msra.mxu0 %v3607_v54  ;;  %3513 = vmatprep.mubr.msk.f32.mxu0 %vm3683_vm0, %v3682_v1 }
0x169d   :  { %3507 = vmatprep.subr.mxu0 %v3682_v1 }
0x169e   :  { %v2725_v55 = vpop.permute.xlu1 %2724  ;;  %3508 = vmatpush3.msra.mxu0 %v3608_v56 }
0x169f   :  { %3503 = vmatmul.mubr.msk.f32.vlgmr.msra.gmra.mxu1 %vm159_vm7, %v2725_v55  ;;  %3509 = vmatprep.subr.mxu0 %v3682_v1 }
0x16a0   :  { %3510 = vmatpush3.msra.mxu0 %v3609_v57 }
0x16a1   :  { %3511 = vmatprep.subr.mxu0 %v3682_v1 }
0x16a2   :  { %3512 = vmatpush3.msra.mxu0 %v3610_v58 }
0x1753   :  { %v2549_v59 = vpop.f32.mrf.mxu0 }
0x1754   :  { %v2550_v61 = vadd.f32 %v4346_v60, %v2549_v59 }
0x1755   :  { %v3471_v63 = vpop.f32.mrf.mxu0 }
0x1756   :  { %2553 = vst [vmem:[%s4380_s2 + $0xc] sm:$0x3] %v2550_v61 }
0x175b   :  { %v2718_v62 = vpop.f32.mrf.mxu0 }
0x175c   :  { %v2719_v2 = vadd.f32 %v4302_v37, %v2718_v62 }
0x175d   :  { %v3493_v0 = vpop.f32.mrf.mxu0 }
0x175f   :  { %v2794_v5 = vpop.f32.mrf.mxu1 }
0x1760   :  { %v2798_v7 = vadd.f32 %v2794_v5, %v2719_v2 }
0x1761   :  { %v3504_v3 = vpop.f32.mrf.mxu1 }
0x1762   :  { %v2799_v1 = vmul.f32 %v2798_v7, %v3756_v25 }
0x1764   :  { %3590 = vtanh.f32 %v2799_v1 }
0x1771   :  { %v3591_v8 = vpop.eup %3590 }
0x1772   :  { %v2801_v23 = vmul.f32 %v3591_v8, %v3756_v25 }
0x1774   :  { %v2802_v11 = vadd.f32 %v2801_v23, %v3760_v29 }
0x1776   :  { %2805 = vrot.lane.b32.xlu0 %v2802_v11, %s3685_s0  ;;  %v2803_v22 = vmul.f32 %v2802_v11, %v4317_v42 }
0x17e8   :  { %v2806_v12 = vpop.permute.xlu0 %2805 }
0x17e9   :  { %v2808_v13 = vmul.f32 %v2806_v12, %v2802_v11 }
0x17eb   :  { %2810 = vrot.lane.b32.xlu1 %v2808_v13, %s3686_s25 }
0x185d   :  { %v2811_v24 = vpop.permute.xlu1 %2810 }
0x185e   :  { %v2813_v26 = vadd.f32 %v2811_v24, %v2803_v22 }
0x1860   :  { %3592 = vtanh.f32 %v2813_v26 }
0x186d   :  { %v3593_v27 = vpop.eup %3592 }
0x186e   :  { %2816 = vrot.lane.b32.xlu0 %v3593_v27, %s3685_s0 }
0x1872   :  { %2896 = vrot.lane.b32.xlu0 %v2651_v50, %s3686_s25 }
0x1876   :  { %2911 = vrot.lane.b32.xlu0 %v2813_v26, %s3687_s14 }
0x18e0   :  { %v2817_v25 = vpop.permute.xlu0 %2816 }
0x18e1   :  { %v2819_v29 = vmul.f32 %v2817_v25, %v2802_v11 }
0x18e3   :  { %2821 = vrot.lane.b32.xlu1 %v2819_v29, %s3686_s25 }
0x18e4   :  { %v2897_v17 = vpop.permute.xlu0 %2896 }
0x18e5   :  { %2900 = vst.msk [vmem:[#allocation5 - $0x6] sm:$0xc0] %vm2899_vm8, %v2897_v17 }
0x18e7   :  { %2906 = vrot.lane.b32.xlu1 %v4321_v36, %s3687_s14 }
0x18e8   :  { %v2912_v37 = vpop.permute.xlu0 %2911 }
0x18e9   :  { %2915 = vst.msk [vmem:[#allocation6 + $0x2] sm:$0x3] %vm2903_vm9, %v2912_v37 }
0x1955   :  { %v2822_v39 = vpop.permute.xlu1 %2821 }
0x1956   :  { %2904 = vst.msk [vmem:[#allocation5 + $0x2] sm:$0x3] %vm2903_vm9, %v2822_v39  ;;  %3514 = vmatmul.mubr.msk.f32.vlgmr.msra.gmra.mxu0 %vm159_vm7, %v2822_v39 }
0x1959   :  { %v2907_v41 = vpop.permute.xlu1 %2906 }
0x195a   :  { %2909 = vst.msk [vmem:[#allocation6 - $0x6] sm:$0xc0] %vm2899_vm8, %v2907_v41 }
0x195b   :  { %3643 = shalt.err (!%p3640_p9)
}
0x195c   :  { %s3690_s20 = smov 2   ;;  %s3652_s23 = scalar_lea.vmem %s2936_s18, 64 }
0x195d   :  { %2929 = dma.vmem_to_hbm [thread:$0]  %s2924_s16, 64, %s4381_s3, [#allocation4], %s3686_s25, %s3686_s25, %s3690_s20  }
0x195e   :  { %p3653_p10 = scmp.ne.s32.totalorder %s2936_s18, %s3652_s23  ;;  %p3657_p11 = scmp.lt.s32.totalorder %s2936_s18, %s2936_s18 }
0x195f   :  { %p3658_p12 = scmp.lt.s32.totalorder %s3652_s23, %s3652_s23 }
0x1961   :  { %p3659_p13 = por %p3658_p12, %p3657_p11 }
0x1963   :  { %p3660_p0 = pnand %p3659_p13, %p3653_p10 }
0x1965   :  { %3663 = shalt.err (!%p3660_p0)
}
0x1966   :  { %2941 = dma.vmem_to_hbm [thread:$0]  %s2936_s18, 64, %s4382_s4, [#allocation7], %s3686_s25, %s3686_s25, %s3690_s20  }
0x1a16   :  { %v2891_v43 = vpop.f32.mrf.mxu0 }
0x1a17   :  { %v2892_v18 = vadd.f32 %v4346_v60, %v2891_v43 }
0x1a18   :  { %v3515_v20 = vpop.f32.mrf.mxu0 }
0x1a19   :  { %2895 = vst [vmem:[%s4380_s2 + $0xe] sm:$0x3] %v2892_v18 }
0x1a1a   :  { %3674 = dma.done.wait [#allocation4], 64  }
0x1a1b   :  { %3675 = vsyncadd [#allocation4], 4294967232 }
0x1a1c   :  { %3676 = dma.done.wait [#allocation7], 64  }
0x1a1d   :  { %3677 = vsyncadd [#allocation7], 4294967232 }
0x1a1e   :  { %2950 = vsyncpa [#allocation3], 1 }
0x1a1f   :  { %2951 = vsyncpa [#allocation4], 1 }
0x1a20   :  { %2952 = vsyncpa [#allocation7], 1 }

</bundles_post_ra>
